<compile_context>
chip_gen: v6e
topology: v6e:2x2x1
jax: 0.10.0
libtpu: 0.0.40
codegen_flags: <defaults>
</compile_context>

<pallas_src>
import numpy as np
import jax
import jax.numpy as jnp
from jax.experimental import pallas as pl
from jax.experimental.pallas import tpu as pltpu

RESOLUTIONS = (56, 28, 14, 7)


def _round_up(x, m):
    return (x + m - 1) // m * m


# ---------------- deterministic camera parameter setup (plain numpy glue) ---
def _normal(v):
    return v / np.linalg.norm(v)


def camera_mat(param):
    theta = param[0] * np.pi / 180.0
    camy = param[3] * np.sin(param[1] * np.pi / 180.0)
    lens = param[3] * np.cos(param[1] * np.pi / 180.0)
    camx = lens * np.cos(theta)
    camz = lens * np.sin(theta)
    Z = np.stack([camx, camy, camz])
    x = camy * np.cos(theta + np.pi)
    z = camy * np.sin(theta + np.pi)
    Y = np.stack([x, lens, z])
    X = np.cross(Y, Z)
    cm_mat = np.stack([_normal(X), _normal(Y), _normal(Z)])
    return cm_mat.astype(np.float32), Z.astype(np.float32)


# ---------------------------------- Pallas kernel ---------------------------
def _make_kernel(views, row_off, res_list, cp):
    inv_v = np.float32(1.0 / float(views))

    def kernel(po_ref, rot_ref, camo_ref, tbl_ref, out_ref):
        v = pl.program_id(1)

        # camera_trans(camera[v], point_origin): (p - o_v) @ c_v.T, written as
        # a broadcasted linear combination (avoids a tiny MXU matmul).
        rot = rot_ref[...]                                  # [3, 3] == c_v.T
        pc = po_ref[...] - camo_ref[...]                    # [TN, 3]
        p_cur = (pc[:, 0:1] * rot[0:1, :]
                 + pc[:, 1:2] * rot[1:2, :]
                 + pc[:, 2:3] * rot[2:3, :])                # [TN, 3]

        X = p_cur[:, 0:1]
        Y = p_cur[:, 1:2]
        Z = p_cur[:, 2:3]
        # No guard on Z == 0: matches the reference exactly.
        h = jnp.clip(248.0 * ((-Y) / (-Z)) + 112.0, 0.0, 223.0)
        w = jnp.clip(248.0 * (X / (-Z)) + 112.0, 0.0, 223.0)

        # Pixel indices once at res=56 (exact /4); coarser levels by integer
        # right shift — bit-exact with the reference's truncating /8,/16,/32.
        h56 = (h * 0.25).astype(jnp.int32)                  # [TN, 1]
        w56 = (w * 0.25).astype(jnp.int32)                  # [TN, 1]

        npts = po_ref.shape[0]
        k_rows = tbl_ref.shape[1]
        tbl = tbl_ref[v]                                    # [K_pad, CP] view slab (VMEM resident)

        # Combined block-diagonal one-hot: one iota, four row targets OR'd.
        iota = jax.lax.broadcasted_iota(jnp.int32, (npts, k_rows), 1)
        hit = None
        for k, res in enumerate(res_list):
            hk = h56 >> k
            wk = w56 >> k
            r = row_off[k] + hk * res + wk                  # [TN, 1]
            m = iota == r
            hit = m if hit is None else (hit | m)
        onehot = hit.astype(tbl.dtype)                      # 0/1, exact in bf16

        prec = (jax.lax.Precision.HIGHEST if tbl.dtype == jnp.float32
                else jax.lax.Precision.DEFAULT)
        # All four gathers in ONE MXU matmul (block-diagonal table).
        gath = jnp.dot(onehot, tbl, preferred_element_type=jnp.float32,
                       precision=prec)                      # [TN, CP] f32

        # Accumulate straight into the resident output block:
        # [0:CP) = running max, [CP:2CP) = running sum, [2CP:3CP) = sum of sq.
        @pl.when(v == 0)
        def _init():
            out_ref[:, 0:cp] = gath
            out_ref[:, cp:2 * cp] = gath
            out_ref[:, 2 * cp:3 * cp] = gath * gath

        @pl.when(v > 0)
        def _acc():
            out_ref[:, 0:cp] = jnp.maximum(out_ref[:, 0:cp], gath)
            out_ref[:, cp:2 * cp] = out_ref[:, cp:2 * cp] + gath
            out_ref[:, 2 * cp:3 * cp] = out_ref[:, 2 * cp:3 * cp] + gath * gath

        @pl.when(v == views - 1)
        def _finalize():
            mean = out_ref[:, cp:2 * cp] * inv_v
            var = out_ref[:, 2 * cp:3 * cp] * inv_v - mean * mean
            out_ref[:, cp:2 * cp] = mean
            out_ref[:, 2 * cp:3 * cp] = jnp.sqrt(jnp.maximum(var, 0.0))

    return kernel


# ---------------------------------- wrapper ---------------------------------
def graph_projection(inputs, img_feats, cameras, views, *,
                     tile_n=256, feat_dtype=jnp.bfloat16):
    inputs = jnp.asarray(inputs, jnp.float32)
    N = inputs.shape[0]

    # Channel packing: all levels share one 128-lane slab.
    chans = tuple(int(f.shape[-1]) for f in img_feats)
    ch_off, acc = [], 0
    for c in chans:
        ch_off.append(acc)
        acc += c
    CP = _round_up(acc, 128)                                # 120 -> 128

    # Row packing: level k's pixels occupy rows [row_off[k], row_off[k]+res^2).
    row_off, acc = [], 0
    for res in RESOLUTIONS:
        row_off.append(acc)
        acc += res * res
    K_pad = _round_up(acc, 8)                               # 4165 -> 4168

    # Camera matrices (small deterministic setup, plain numpy).
    cams = [camera_mat(np.asarray(cameras[i], np.float64)) for i in range(views)]
    c0, o0 = cams[0]
    inv_c0t = np.linalg.inv(c0.T).astype(np.float32)        # inv(c0.T)
    rot_t = np.stack([c[0].T for c in cams]).astype(np.float32)      # [V,3,3]
    cam_o = np.stack([c[1] for c in cams]).astype(np.float32).reshape(views, 1, 3)

    # View-invariant camera_trans_inv hoisted out of the per-view grid loop.
    p_origin = inputs @ jnp.asarray(inv_c0t) + jnp.asarray(o0)[None, :]

    # Point tiling: >=2 point tiles when possible (v7x dual-TC occupancy).
    if N >= 2 * tile_n:
        TN = tile_n
    else:
        TN = max(8, _round_up((N + 1) // 2, 8))
    N_pad = _round_up(N, TN)
    if N_pad > N:
        p_origin = jnp.pad(p_origin, ((0, N_pad - N), (0, 0)), mode="edge")

    # One block-diagonal gather table per loop view, quirky view index
    # (int(v / (224/res)) = v*res//224) resolved statically here.
    tbl = jnp.zeros((views, K_pad, CP), dtype=feat_dtype)
    for k, (res, roff, coff, c) in enumerate(zip(RESOLUTIONS, row_off, ch_off, chans)):
        f = jnp.asarray(img_feats[k], jnp.float32)
        vidx = np.array([v * res // 224 for v in range(views)], dtype=np.int32)
        slab = f[vidx].reshape(views, res * res, c).astype(feat_dtype)
        tbl = tbl.at[:, roff:roff + res * res, coff:coff + c].set(slab)

    grid = (N_pad // TN, views)                             # (point tiles, views)
    grid_spec = pltpu.PrefetchScalarGridSpec(
        num_scalar_prefetch=0,
        grid=grid,
        in_specs=[
            pl.BlockSpec((TN, 3), lambda n, v: (n, 0)),            # point_origin tile
            pl.BlockSpec((None, 3, 3), lambda n, v: (v, 0, 0)),    # c_v.T
            pl.BlockSpec((None, 1, 3), lambda n, v: (v, 0, 0)),    # o_v
            # Constant block index: all view tables loaded once, VMEM-resident.
            pl.BlockSpec((views, K_pad, CP), lambda n, v: (0, 0, 0)),
        ],
        out_specs=pl.BlockSpec((TN, 3 * CP), lambda n, v: (n, 0)),
    )

    tbl_bytes = views * K_pad * CP * tbl.dtype.itemsize
    cost = pl.CostEstimate(
        flops=int(2 * N_pad * views * K_pad * CP),
        transcendentals=int(N_pad * (2 * views + CP)),
        bytes_accessed=int(tbl_bytes + N_pad * 3 * 4 + N_pad * 3 * CP * 4),
    )

    kernel = _make_kernel(views, tuple(row_off), RESOLUTIONS, CP)
    packed = pl.pallas_call(
        kernel,
        out_shape=jax.ShapeDtypeStruct((N_pad, 3 * CP), jnp.float32),
        grid_spec=grid_spec,
        compiler_params=pltpu.CompilerParams(
            dimension_semantics=("parallel", "arbitrary"),
            vmem_limit_bytes=32 * 1024 * 1024),
        cost_estimate=cost,
    )(p_origin, jnp.asarray(rot_t), jnp.asarray(cam_o), tbl)

    # Strip N padding and lane padding back to the reference column layout:
    # [coord | max(all levels) | mean(all levels) | std(all levels)].
    packed = packed[:N]
    cols = [inputs]
    for s in range(3):                                      # max, mean, std
        for coff, c in zip(ch_off, chans):
            cols.append(packed[:, s * CP + coff: s * CP + coff + c])
    return jnp.concatenate(cols, axis=1)


# ---------------------------------- demo ------------------------------------
if __name__ == "__main__":
    views = 2
    N = 16
    chans = (8, 16, 32, 64)

    # Deterministic camera params: [azimuth_deg, elevation_deg, _, distance, _]
    cameras = np.array([[30.0, 25.0, 0.0, 1.2, 25.0],
                        [150.0, 20.0, 0.0, 1.2, 25.0]], dtype=np.float32)

    key = jax.random.PRNGKey(0)
    k_pts, k0, k1, k2, k3 = jax.random.split(key, 5)
    inputs = (0.25 * jax.random.normal(k_pts, (N, 3), jnp.float32)
              + jnp.array([0.0, 0.0, -1.0], jnp.float32))
    img_feats = [
        jax.random.normal(k0, (views, 56, 56, chans[0]), jnp.float32),
        jax.random.normal(k1, (views, 28, 28, chans[1]), jnp.float32),
        jax.random.normal(k2, (views, 14, 14, chans[2]), jnp.float32),
        jax.random.normal(k3, (views, 7, 7, chans[3]), jnp.float32),
    ]

    out = graph_projection(inputs, img_feats, cameras, views)
    out = jax.block_until_ready(out)

    assert out.shape == (N, 3 + 3 * sum(chans)), out.shape
    assert bool(jnp.all(jnp.isfinite(out)))
    print("KERNEL_OK")
</pallas_src>

<mosaic_0001>
module attributes {stable_mosaic.version = 11 : i64} {
  func.func @kernel(%arg0: i32, %arg1: i32, %arg2: memref<8x3xf32, #tpu.memory_space<vmem>>, %arg3: memref<1x3x3xf32, #tpu.memory_space<vmem>>, %arg4: memref<1x1x3xf32, #tpu.memory_space<vmem>>, %arg5: memref<2x4168x128xbf16, #tpu.memory_space<vmem>>, %arg6: memref<8x384xf32, #tpu.memory_space<vmem>>) attributes {dimension_semantics = [#tpu.dimension_semantics<parallel>, #tpu.dimension_semantics<arbitrary>], iteration_bounds = array<i64: 2, 2>, scalar_prefetch = 0 : i64, scratch_operands = 0 : i64, tpu.core_type = #tpu.core_type<tc>, window_params = [{transform_indices = @transform_0, window_bounds = array<i64: 8, 3>}, {transform_indices = @transform_1, window_bounds = array<i64: 1, 3, 3>}, {transform_indices = @transform_2, window_bounds = array<i64: 1, 1, 3>}, {pipeline_mode = #tpu.pipeline_mode<synchronous>, transform_indices = @transform_3, window_bounds = array<i64: 2, 4168, 128>}, {transform_indices = @transform_4, window_bounds = array<i64: 8, 384>}]} {
    %c0 = arith.constant 0 : index
    %c0_0 = arith.constant 0 : index
    %c0_1 = arith.constant 0 : index
    %0 = vector.load %arg3[%c0, %c0_0, %c0_1] : memref<1x3x3xf32, #tpu.memory_space<vmem>>, vector<1x3x3xf32>
    %1 = vector.shape_cast %0 : vector<1x3x3xf32> to vector<3x3xf32>
    %c0_2 = arith.constant 0 : index
    %c0_3 = arith.constant 0 : index
    %2 = vector.load %arg2[%c0_2, %c0_3] : memref<8x3xf32, #tpu.memory_space<vmem>>, vector<8x3xf32>
    %c0_4 = arith.constant 0 : index
    %c0_5 = arith.constant 0 : index
    %c0_6 = arith.constant 0 : index
    %3 = vector.load %arg4[%c0_4, %c0_5, %c0_6] : memref<1x1x3xf32, #tpu.memory_space<vmem>>, vector<1x1x3xf32>
    %4 = vector.shape_cast %3 : vector<1x1x3xf32> to vector<1x3xf32>
    %5 = vector.broadcast %4 : vector<1x3xf32> to vector<8x3xf32>
    %6 = arith.subf %2, %5 : vector<8x3xf32>
    %7 = vector.extract_strided_slice %6 {offsets = [0, 0], sizes = [8, 1], strides = [1, 1]} : vector<8x3xf32> to vector<8x1xf32>
    %8 = vector.extract_strided_slice %1 {offsets = [0, 0], sizes = [1, 3], strides = [1, 1]} : vector<3x3xf32> to vector<1x3xf32>
    %9 = vector.broadcast %7 : vector<8x1xf32> to vector<8x3xf32>
    %10 = vector.broadcast %8 : vector<1x3xf32> to vector<8x3xf32>
    %11 = arith.mulf %9, %10 : vector<8x3xf32>
    %12 = vector.extract_strided_slice %6 {offsets = [0, 1], sizes = [8, 1], strides = [1, 1]} : vector<8x3xf32> to vector<8x1xf32>
    %13 = vector.extract_strided_slice %1 {offsets = [1, 0], sizes = [1, 3], strides = [1, 1]} : vector<3x3xf32> to vector<1x3xf32>
    %14 = vector.broadcast %12 : vector<8x1xf32> to vector<8x3xf32>
    %15 = vector.broadcast %13 : vector<1x3xf32> to vector<8x3xf32>
    %16 = arith.mulf %14, %15 : vector<8x3xf32>
    %17 = arith.addf %11, %16 : vector<8x3xf32>
    %18 = vector.extract_strided_slice %6 {offsets = [0, 2], sizes = [8, 1], strides = [1, 1]} : vector<8x3xf32> to vector<8x1xf32>
    %19 = vector.extract_strided_slice %1 {offsets = [2, 0], sizes = [1, 3], strides = [1, 1]} : vector<3x3xf32> to vector<1x3xf32>
    %20 = vector.broadcast %18 : vector<8x1xf32> to vector<8x3xf32>
    %21 = vector.broadcast %19 : vector<1x3xf32> to vector<8x3xf32>
    %22 = arith.mulf %20, %21 : vector<8x3xf32>
    %23 = arith.addf %17, %22 : vector<8x3xf32>
    %24 = vector.extract_strided_slice %23 {offsets = [0, 0], sizes = [8, 1], strides = [1, 1]} : vector<8x3xf32> to vector<8x1xf32>
    %25 = vector.extract_strided_slice %23 {offsets = [0, 1], sizes = [8, 1], strides = [1, 1]} : vector<8x3xf32> to vector<8x1xf32>
    %26 = vector.extract_strided_slice %23 {offsets = [0, 2], sizes = [8, 1], strides = [1, 1]} : vector<8x3xf32> to vector<8x1xf32>
    %cst = arith.constant 0.000000e+00 : f32
    %27 = vector.broadcast %cst : f32 to vector<8x1xf32>
    %28 = arith.subf %27, %25 : vector<8x1xf32>
    %cst_7 = arith.constant 0.000000e+00 : f32
    %29 = vector.broadcast %cst_7 : f32 to vector<8x1xf32>
    %30 = arith.subf %29, %26 : vector<8x1xf32>
    %31 = arith.divf %28, %30 : vector<8x1xf32>
    %cst_8 = arith.constant 2.480000e+02 : f32
    %32 = vector.broadcast %cst_8 : f32 to vector<8x1xf32>
    %33 = arith.mulf %32, %31 : vector<8x1xf32>
    %cst_9 = arith.constant 1.120000e+02 : f32
    %34 = vector.broadcast %cst_9 : f32 to vector<8x1xf32>
    %35 = arith.addf %33, %34 : vector<8x1xf32>
    %cst_10 = arith.constant 0.000000e+00 : f32
    %cst_11 = arith.constant 2.230000e+02 : f32
    %36 = vector.broadcast %cst_10 : f32 to vector<8x1xf32>
    %37 = arith.maximumf %36, %35 : vector<8x1xf32>
    %38 = vector.broadcast %cst_11 : f32 to vector<8x1xf32>
    %39 = arith.minimumf %38, %37 : vector<8x1xf32>
    %cst_12 = arith.constant 0.000000e+00 : f32
    %40 = vector.broadcast %cst_12 : f32 to vector<8x1xf32>
    %41 = arith.subf %40, %26 : vector<8x1xf32>
    %42 = arith.divf %24, %41 : vector<8x1xf32>
    %cst_13 = arith.constant 2.480000e+02 : f32
    %43 = vector.broadcast %cst_13 : f32 to vector<8x1xf32>
    %44 = arith.mulf %43, %42 : vector<8x1xf32>
    %cst_14 = arith.constant 1.120000e+02 : f32
    %45 = vector.broadcast %cst_14 : f32 to vector<8x1xf32>
    %46 = arith.addf %44, %45 : vector<8x1xf32>
    %cst_15 = arith.constant 0.000000e+00 : f32
    %cst_16 = arith.constant 2.230000e+02 : f32
    %47 = vector.broadcast %cst_15 : f32 to vector<8x1xf32>
    %48 = arith.maximumf %47, %46 : vector<8x1xf32>
    %49 = vector.broadcast %cst_16 : f32 to vector<8x1xf32>
    %50 = arith.minimumf %49, %48 : vector<8x1xf32>
    %cst_17 = arith.constant 2.500000e-01 : f32
    %51 = vector.broadcast %cst_17 : f32 to vector<8x1xf32>
    %52 = arith.mulf %39, %51 : vector<8x1xf32>
    %53 = arith.fptosi %52 : vector<8x1xf32> to vector<8x1xi32>
    %cst_18 = arith.constant 2.500000e-01 : f32
    %54 = vector.broadcast %cst_18 : f32 to vector<8x1xf32>
    %55 = arith.mulf %50, %54 : vector<8x1xf32>
    %56 = arith.fptosi %55 : vector<8x1xf32> to vector<8x1xi32>
    %57 = arith.index_cast %arg1 : i32 to index
    %c0_19 = arith.constant 0 : index
    %c0_20 = arith.constant 0 : index
    %58 = vector.load %arg5[%57, %c0_19, %c0_20] : memref<2x4168x128xbf16, #tpu.memory_space<vmem>>, vector<1x4168x128xbf16>
    %59 = vector.shape_cast %58 : vector<1x4168x128xbf16> to vector<4168x128xbf16>
    %60 = tpu.iota {dimensions = array<i32: 1>} : vector<8x4168xi32>
    %c0_i32 = arith.constant 0 : i32
    %61 = vector.broadcast %c0_i32 : i32 to vector<8x1xi32>
    %62 = arith.shrsi %53, %61 : vector<8x1xi32>
    %c0_i32_21 = arith.constant 0 : i32
    %63 = vector.broadcast %c0_i32_21 : i32 to vector<8x1xi32>
    %64 = arith.shrsi %56, %63 : vector<8x1xi32>
    %c56_i32 = arith.constant 56 : i32
    %65 = vector.broadcast %c56_i32 : i32 to vector<8x1xi32>
    %66 = arith.muli %62, %65 : vector<8x1xi32>
    %c0_i32_22 = arith.constant 0 : i32
    %67 = vector.broadcast %c0_i32_22 : i32 to vector<8x1xi32>
    %68 = arith.addi %67, %66 : vector<8x1xi32>
    %69 = arith.addi %68, %64 : vector<8x1xi32>
    %70 = vector.broadcast %69 : vector<8x1xi32> to vector<8x4168xi32>
    %71 = arith.cmpi eq, %60, %70 : vector<8x4168xi32>
    %c1_i32 = arith.constant 1 : i32
    %72 = vector.broadcast %c1_i32 : i32 to vector<8x1xi32>
    %73 = arith.shrsi %53, %72 : vector<8x1xi32>
    %c1_i32_23 = arith.constant 1 : i32
    %74 = vector.broadcast %c1_i32_23 : i32 to vector<8x1xi32>
    %75 = arith.shrsi %56, %74 : vector<8x1xi32>
    %c28_i32 = arith.constant 28 : i32
    %76 = vector.broadcast %c28_i32 : i32 to vector<8x1xi32>
    %77 = arith.muli %73, %76 : vector<8x1xi32>
    %c3136_i32 = arith.constant 3136 : i32
    %78 = vector.broadcast %c3136_i32 : i32 to vector<8x1xi32>
    %79 = arith.addi %78, %77 : vector<8x1xi32>
    %80 = arith.addi %79, %75 : vector<8x1xi32>
    %81 = vector.broadcast %80 : vector<8x1xi32> to vector<8x4168xi32>
    %82 = arith.cmpi eq, %60, %81 : vector<8x4168xi32>
    %83 = arith.ori %71, %82 : vector<8x4168xi1>
    %c2_i32 = arith.constant 2 : i32
    %84 = vector.broadcast %c2_i32 : i32 to vector<8x1xi32>
    %85 = arith.shrsi %53, %84 : vector<8x1xi32>
    %c2_i32_24 = arith.constant 2 : i32
    %86 = vector.broadcast %c2_i32_24 : i32 to vector<8x1xi32>
    %87 = arith.shrsi %56, %86 : vector<8x1xi32>
    %c14_i32 = arith.constant 14 : i32
    %88 = vector.broadcast %c14_i32 : i32 to vector<8x1xi32>
    %89 = arith.muli %85, %88 : vector<8x1xi32>
    %c3920_i32 = arith.constant 3920 : i32
    %90 = vector.broadcast %c3920_i32 : i32 to vector<8x1xi32>
    %91 = arith.addi %90, %89 : vector<8x1xi32>
    %92 = arith.addi %91, %87 : vector<8x1xi32>
    %93 = vector.broadcast %92 : vector<8x1xi32> to vector<8x4168xi32>
    %94 = arith.cmpi eq, %60, %93 : vector<8x4168xi32>
    %95 = arith.ori %83, %94 : vector<8x4168xi1>
    %c3_i32 = arith.constant 3 : i32
    %96 = vector.broadcast %c3_i32 : i32 to vector<8x1xi32>
    %97 = arith.shrsi %53, %96 : vector<8x1xi32>
    %c3_i32_25 = arith.constant 3 : i32
    %98 = vector.broadcast %c3_i32_25 : i32 to vector<8x1xi32>
    %99 = arith.shrsi %56, %98 : vector<8x1xi32>
    %c7_i32 = arith.constant 7 : i32
    %100 = vector.broadcast %c7_i32 : i32 to vector<8x1xi32>
    %101 = arith.muli %97, %100 : vector<8x1xi32>
    %c4116_i32 = arith.constant 4116 : i32
    %102 = vector.broadcast %c4116_i32 : i32 to vector<8x1xi32>
    %103 = arith.addi %102, %101 : vector<8x1xi32>
    %104 = arith.addi %103, %99 : vector<8x1xi32>
    %105 = vector.broadcast %104 : vector<8x1xi32> to vector<8x4168xi32>
    %106 = arith.cmpi eq, %60, %105 : vector<8x4168xi32>
    %107 = arith.ori %95, %106 : vector<8x4168xi1>
    %108 = arith.extui %107 : vector<8x4168xi1> to vector<8x4168xi32>
    %109 = arith.sitofp %108 : vector<8x4168xi32> to vector<8x4168xf32>
    %110 = arith.truncf %109 : vector<8x4168xf32> to vector<8x4168xbf16>
    %cst_26 = arith.constant dense<0.000000e+00> : vector<8x128xf32>
    %111 = tpu.matmul %110, %59, %cst_26 {dimension_numbers = #tpu.dot_dimension_numbers<[1], [0], [0], [1], [0, 0, 1, 1], [], []>} : vector<8x4168xbf16>, vector<4168x128xbf16>, vector<8x128xf32> -> vector<8x128xf32>
    %c0_i32_27 = arith.constant 0 : i32
    %112 = arith.cmpi eq, %arg1, %c0_i32_27 : i32
    %113 = arith.extui %112 : i1 to i32
    %c0_i32_28 = arith.constant 0 : i32
    %114 = arith.cmpi ne, %113, %c0_i32_28 : i32
    scf.if %114 {
      %c0_33 = arith.constant 0 : index
      %c0_34 = arith.constant 0 : index
      %121 = vector.load %arg6[%c0_33, %c0_34] : memref<8x384xf32, #tpu.memory_space<vmem>>, vector<8x128xf32>
      tpu.vector_store %arg6[%c0_33, %c0_34], %111 {strides = array<i32>} : memref<8x384xf32, #tpu.memory_space<vmem>>, vector<8x128xf32>,
      %c0_35 = arith.constant 0 : index
      %c128 = arith.constant 128 : index
      %122 = vector.load %arg6[%c0_35, %c128] : memref<8x384xf32, #tpu.memory_space<vmem>>, vector<8x128xf32>
      tpu.vector_store %arg6[%c0_35, %c128], %111 {strides = array<i32>} : memref<8x384xf32, #tpu.memory_space<vmem>>, vector<8x128xf32>,
      %123 = arith.mulf %111, %111 : vector<8x128xf32>
      %c0_36 = arith.constant 0 : index
      %c256 = arith.constant 256 : index
      %124 = vector.load %arg6[%c0_36, %c256] : memref<8x384xf32, #tpu.memory_space<vmem>>, vector<8x128xf32>
      tpu.vector_store %arg6[%c0_36, %c256], %123 {strides = array<i32>} : memref<8x384xf32, #tpu.memory_space<vmem>>, vector<8x128xf32>,
    } else {
    }
    %c0_i32_29 = arith.constant 0 : i32
    %115 = arith.cmpi sgt, %arg1, %c0_i32_29 : i32
    %116 = arith.extui %115 : i1 to i32
    %c0_i32_30 = arith.constant 0 : i32
    %117 = arith.cmpi ne, %116, %c0_i32_30 : i32
    scf.if %117 {
      %c0_33 = arith.constant 0 : index
      %c0_34 = arith.constant 0 : index
      %121 = vector.load %arg6[%c0_33, %c0_34] : memref<8x384xf32, #tpu.memory_space<vmem>>, vector<8x128xf32>
      %122 = arith.maximumf %121, %111 : vector<8x128xf32>
      %c0_35 = arith.constant 0 : index
      %c0_36 = arith.constant 0 : index
      %123 = vector.load %arg6[%c0_35, %c0_36] : memref<8x384xf32, #tpu.memory_space<vmem>>, vector<8x128xf32>
      tpu.vector_store %arg6[%c0_35, %c0_36], %122 {strides = array<i32>} : memref<8x384xf32, #tpu.memory_space<vmem>>, vector<8x128xf32>,
      %c0_37 = arith.constant 0 : index
      %c128 = arith.constant 128 : index
      %124 = vector.load %arg6[%c0_37, %c128] : memref<8x384xf32, #tpu.memory_space<vmem>>, vector<8x128xf32>
      %125 = arith.addf %124, %111 : vector<8x128xf32>
      %c0_38 = arith.constant 0 : index
      %c128_39 = arith.constant 128 : index
      %126 = vector.load %arg6[%c0_38, %c128_39] : memref<8x384xf32, #tpu.memory_space<vmem>>, vector<8x128xf32>
      tpu.vector_store %arg6[%c0_38, %c128_39], %125 {strides = array<i32>} : memref<8x384xf32, #tpu.memory_space<vmem>>, vector<8x128xf32>,
      %c0_40 = arith.constant 0 : index
      %c256 = arith.constant 256 : index
      %127 = vector.load %arg6[%c0_40, %c256] : memref<8x384xf32, #tpu.memory_space<vmem>>, vector<8x128xf32>
      %128 = arith.mulf %111, %111 : vector<8x128xf32>
      %129 = arith.addf %127, %128 : vector<8x128xf32>
      %c0_41 = arith.constant 0 : index
      %c256_42 = arith.constant 256 : index
      %130 = vector.load %arg6[%c0_41, %c256_42] : memref<8x384xf32, #tpu.memory_space<vmem>>, vector<8x128xf32>
      tpu.vector_store %arg6[%c0_41, %c256_42], %129 {strides = array<i32>} : memref<8x384xf32, #tpu.memory_space<vmem>>, vector<8x128xf32>,
    } else {
    }
    %c1_i32_31 = arith.constant 1 : i32
    %118 = arith.cmpi eq, %arg1, %c1_i32_31 : i32
    %119 = arith.extui %118 : i1 to i32
    %c0_i32_32 = arith.constant 0 : i32
    %120 = arith.cmpi ne, %119, %c0_i32_32 : i32
    scf.if %120 {
      %c0_33 = arith.constant 0 : index
      %c128 = arith.constant 128 : index
      %121 = vector.load %arg6[%c0_33, %c128] : memref<8x384xf32, #tpu.memory_space<vmem>>, vector<8x128xf32>
      %cst_34 = arith.constant 5.000000e-01 : f32
      %122 = vector.broadcast %cst_34 : f32 to vector<8x128xf32>
      %123 = arith.mulf %121, %122 : vector<8x128xf32>
      %c0_35 = arith.constant 0 : index
      %c256 = arith.constant 256 : index
      %124 = vector.load %arg6[%c0_35, %c256] : memref<8x384xf32, #tpu.memory_space<vmem>>, vector<8x128xf32>
      %cst_36 = arith.constant 5.000000e-01 : f32
      %125 = vector.broadcast %cst_36 : f32 to vector<8x128xf32>
      %126 = arith.mulf %124, %125 : vector<8x128xf32>
      %127 = arith.mulf %123, %123 : vector<8x128xf32>
      %128 = arith.subf %126, %127 : vector<8x128xf32>
      %c0_37 = arith.constant 0 : index
      %c128_38 = arith.constant 128 : index
      %129 = vector.load %arg6[%c0_37, %c128_38] : memref<8x384xf32, #tpu.memory_space<vmem>>, vector<8x128xf32>
      tpu.vector_store %arg6[%c0_37, %c128_38], %123 {strides = array<i32>} : memref<8x384xf32, #tpu.memory_space<vmem>>, vector<8x128xf32>,
      %cst_39 = arith.constant 0.000000e+00 : f32
      %130 = vector.broadcast %cst_39 : f32 to vector<8x128xf32>
      %131 = arith.maximumf %128, %130 : vector<8x128xf32>
      %132 = math.sqrt %131 : vector<8x128xf32>
      %c0_40 = arith.constant 0 : index
      %c256_41 = arith.constant 256 : index
      %133 = vector.load %arg6[%c0_40, %c256_41] : memref<8x384xf32, #tpu.memory_space<vmem>>, vector<8x128xf32>
      tpu.vector_store %arg6[%c0_40, %c256_41], %132 {strides = array<i32>} : memref<8x384xf32, #tpu.memory_space<vmem>>, vector<8x128xf32>,
    } else {
    }
    return
  }
  func.func @transform_0(%arg0: i32, %arg1: i32) -> (i32, i32) {
    %c0_i32 = arith.constant 0 : i32
    %c0_i32_0 = arith.constant 0 : i32
    return %arg0, %c0_i32 : i32, i32
  }
  func.func @transform_1(%arg0: i32, %arg1: i32) -> (i32, i32, i32) {
    %c0_i32 = arith.constant 0 : i32
    %c0_i32_0 = arith.constant 0 : i32
    %c0_i32_1 = arith.constant 0 : i32
    return %arg1, %c0_i32, %c0_i32_0 : i32, i32, i32
  }
  func.func @transform_2(%arg0: i32, %arg1: i32) -> (i32, i32, i32) {
    %c0_i32 = arith.constant 0 : i32
    %c0_i32_0 = arith.constant 0 : i32
    %c0_i32_1 = arith.constant 0 : i32
    return %arg1, %c0_i32, %c0_i32_0 : i32, i32, i32
  }
  func.func @transform_3(%arg0: i32, %arg1: i32) -> (i32, i32, i32) {
    %c0_i32 = arith.constant 0 : i32
    %c0_i32_0 = arith.constant 0 : i32
    %c0_i32_1 = arith.constant 0 : i32
    %c0_i32_2 = arith.constant 0 : i32
    return %c0_i32, %c0_i32_0, %c0_i32_1 : i32, i32, i32
  }
  func.func @transform_4(%arg0: i32, %arg1: i32) -> (i32, i32) {
    %c0_i32 = arith.constant 0 : i32
    %c0_i32_0 = arith.constant 0 : i32
    return %arg0, %c0_i32 : i32, i32
  }
}

</mosaic_0001>

<bundles_post_ra>
// kernel: tpu_custom_call.1
= control target key start
LH: loop header
LB: loop body
LE: loop exit
PB: predicated region body
PF: predicated region fallthrough
CT: control target
= control target key end

     0   :  { %s6033_s0 = inlined_call_operand.vmem [shape: f32[16,3], index: 0, kind: input, shape index: {}]   ;;  %s6034_s1 = inlined_call_operand.vmem [shape: f32[2,3,3], index: 1, kind: input, shape index: {}]   ;;  %s6035_s2 = inlined_call_operand.hbm [shape: f32[2,1,3], index: 2, kind: input, shape index: {}]   ;;  %s6036_s3 = inlined_call_operand.hbm [shape: bf16[2,4168,128], index: 3, kind: input, shape index: {}]   ;;  %s6037_s4 = inlined_call_operand.hbm [shape: f32[16,384], index: 4, kind: output, shape index: {}]  }
   0x1   :  { %6046 = sst [smem:[#allocation16_spill]] %s6036_s3 }
   0x2   :  { %9 = vsyncpa [#allocation3], 0 }
   0x3   :  { %11 = vsyncpa [#allocation3 + $0x1], 0 }
   0x4   :  { %12 = vsyncpa [#allocation6], 0 }
   0x5   :  { %13 = vsyncpa [#allocation4], 0 }
   0x6   :  { %15 = vsyncpa [#allocation4 + $0x1], 0  ;;  %s5053_s15 = smov 0   ;;  %s5055_s16 = smov 0  }
   0x7   :  { %s5057_s17 = smov 0   ;;  %s5059_s18 = smov 0  }
   0x8   :  { %s5061_s19 = smov 0   ;;  %s5063_s20 = smov 0  }
   0x9   :  { %s5065_s21 = smov 0   ;;  %s5067_s22 = smov 0  }
   0xa   :  { %s5069_s23 = smov 0   ;;  %s5071_s24 = smov 0  }
   0xb   :  { %s5073_s25 = smov 0  }
   0xc LB: > { %6047 = sst [smem:[#allocation11_spill]] %s4972_s15  ;;  %s3683_s26 = sadd.s32 4294967295, %s5012_s25   ;;  %s5012_s25 = sphi %s5073_s25, %s21_s25   ;;  %s5008_s24 = sphi %s5071_s24, %s6152_s24   ;;  %s5004_s23 = sphi %s5069_s23, %s6151_s23   ;;  %s5000_s22 = sphi %s5067_s22, %s6150_s22   ;;  %s4996_s21 = sphi %s5065_s21, %s6149_s21   ;;  %s4992_s20 = sphi %s5063_s20, %s6148_s20   ;;  %s4988_s19 = sphi %s5061_s19, %s6147_s19   ;;  %s4984_s18 = sphi %s5059_s18, %s6146_s18   ;;  %s4980_s17 = sphi %s5057_s17, %s6145_s17   ;;  %s4976_s16 = sphi %s5055_s16, %s6144_s16   ;;  %s4972_s15 = sphi %s5053_s15, %s6143_s15  }
   0xd   : > { %6048 = sst [smem:[#allocation12_spill]] %s5012_s25  ;;  %s3684_s27 = sadd.s32 4294967294, %s5012_s25  }
   0xe   : > { %p105_p0 = scmp.ne.s32.totalorder %s4988_s19, %s4984_s18  ;;  %p5109_p1 = scmp.eq.s32.totalorder %s3683_s26, 0 }
   0xf   : > { %s139_s29 = sadd.s32 1, %s4980_s17  ;;  %p149_p2 = scmp.ne.s32.totalorder %s4980_s17, %s4976_s16 }
  0x10   : > { %p5118_p3 = por %p5109_p1, %p105_p0  ;;  %p150_p4 = scmp.eq.s32.totalorder %s3683_s26, 3 }
  0x11   : > { %p155_p5 = scmp.ne.s32.totalorder %s4976_s16, %s4972_s15  ;;  %p156_p6 = scmp.eq.s32.totalorder %s3684_s27, 3 }
  0x12   : > { %p5124_p7 = por %p150_p4, %p149_p2  ;;  %p3685_p8 = scmp.ge.s32.totalorder %s5012_s25, 1 }
  0x13   : > { %p5129_p9 = por %p156_p6, %p155_p5  ;;  %p163_p10 = scmp.lt.s32.totalorder %s5012_s25, 5 }
  0x14   : > { %s6051_s5 = scalar_select %p5124_p7, 1, 0 }
  0x15   : > { %s6052_s6 = scalar_select %p5129_p9, 1, 0 }
  0x16   : > { %p5134_p11 = pnand %p3685_p8, %p163_p10  ;;  %s5014_s8 = smov [#allocation5]  }
  0x17   : > { %6053 = sst [smem:[#allocation13_spill]] %s6052_s6  ;;  %s175_s9 = sshll.u32 %s5014_s8, 4  ;;  %s176_s9 = int_to_ptr.vmem [resolvable:$true] %s175_s9 }
  0x18   : > { %p4447_p12 = pneg %p5134_p11  ;;  %s4845_s10 = scalar_lea.vmem %s176_s9, 66688 }
  0x19   : > { %p4846_p2 = scmp.ne.s32.totalorder %s176_s9, %s4845_s10  ;;  %p4853_p6 = scmp.lt.s32.totalorder %s176_s9, %s176_s9 }
  0x1a   : > { %p4448_p13 = pnand %p4447_p12, %p5109_p1  ;;  %p4854_p9 = scmp.lt.s32.totalorder %s4845_s10, %s4845_s10 }
  0x1c   : > { %p4836_p0 = pneg %p4448_p13  ;;  %p4855_p7 = por %p4854_p9, %p4853_p6 }
  0x1e   : > { %p4848_p4 = pnand %p4846_p2, %p4836_p0 }
  0x20   : > { %p4849_p5 = pneg %p4848_p4 }
  0x22   : > { %p4856_p8 = pnand %p4855_p7, %p4849_p5 }
  0x24   : > { %4859 = shalt.err (!%p4856_p8)
}
  0x25   : > { %s5015_s11 = smov 64   ;;  %s5016_s12 = smov 4  }
  0x26   : > { %s6055_s3 = sld [smem:[#allocation16_spill]]  ;;  %s30_s18 = sadd.s32 1, %s5004_s23 }
  0x27   : > { %p31_p7 = scmp.ge.s32.totalorder %s30_s18, 2  ;;  %s33_s26 = sadd.s32 1, %s5008_s24 }
  0x28   : > { %s92_s27 = sadd.s32 1, %s4992_s20  ;;  %p99_p9 = scmp.ne.s32.totalorder %s4992_s20, %s4988_s19 }
  0x29   : > { %s6154_s18 = smov (%p31_p7, %s30_s18), 0  ;;  %s6156_s26 = smov (!%p31_p7, %s33_s26), %s5008_s24 }
  0x2a   : > { %6056 = sst [smem:[#allocation14_spill]] %s6154_s18  ;;  %s89_s8 = ssub.s32 %s5004_s23, %s6154_s18 }
  0x2b   : > { %p100_p10 = scmp.eq.s32.totalorder %s5012_s25, 0  ;;  %p35_p12 = scmp.ge.s32.totalorder %s6156_s26, 2 }
  0x2c   : > { %4450 = dma.hbm_to_vmem [thread:$0]  (!%p4448_p13), %s6055_s3, 66688, %s176_s9, [#allocation6], %s5015_s11, %s5015_s11, %s5016_s12  }
  0x2d   : > { %p90_p0 = scmp.eq.s32.totalorder %s89_s8, 0  ;;  %p5156_p2 = por %p100_p10, %p99_p9 }
  0x2e   : > { %p4460_p13 = scmp.lt.s32.totalorder %s5012_s25, 4  ;;  %s6158_s26 = smov (%p35_p12, %s6156_s26), 0 }
  0x2f   : > { %6058 = sst [smem:[#allocation15_spill]] %s6158_s26  ;;  %s136_s11 = ssub.s32 %s5008_s24, %s6158_s26 }
  0x30   : > { %s5164_s10 = scalar_select %p90_p0, %s4992_s20, %s92_s27  }
  0x31   : > { %s203_s12 = sand.u32 1, %s4992_s20   ;;  %p137_p4 = scmp.eq.s32.totalorder %s136_s11, 0 }
  0x32   : > { %s3688_s13 = sshll.u32 %s5004_s23, 4  ;;  %s206_s6 = scalar_lea.vmem [#allocation2], %s203_s12 }
  0x33   : > { %s5173_s14 = scalar_select %p137_p4, %s4980_s17, %s139_s29  }
  0x34   : > { %s211_s18 = scalar_lea.hbm %s6035_s2, %s3688_s13  ;;  %s213_s15 = sshll.u32 %s206_s6, 4  ;;  %s214_s15 = int_to_ptr.vmem [resolvable:$true] %s213_s15 }
  0x35   : > { %p5180_p5 = pnand %p4460_p13, %p5156_p2  ;;  %s204_s27 = scalar_lea.sflag [#allocation3], %s203_s12 }
  0x36   : > { %s4873_s11 = scalar_lea.vmem %s214_s15, 16  ;;  %s5017_s29 = smov [#allocation2]  }
  0x37   : > { %p4862_p6 = pneg %p5180_p5  ;;  %p4874_p8 = scmp.ne.s32.totalorder %s214_s15, %s4873_s11 }
  0x38   : > { %s4878_s26 = sshll.u32 %s5017_s29, 4  ;;  %s4879_s26 = int_to_ptr.vmem [resolvable:$false] %s4878_s26 }
  0x39   : > { %p4876_p7 = pnand %p4874_p8, %p4862_p6  ;;  %s4880_s3 = scalar_lea.vmem %s4879_s26, 32 }
  0x3a   : > { %p4881_p10 = scmp.lt.s32.totalorder %s214_s15, %s4879_s26  ;;  %p4882_p12 = scmp.lt.s32.totalorder %s4880_s3, %s4873_s11 }
  0x3b   : > { %p4877_p9 = pneg %p4876_p7 }
  0x3c   : > { %p4883_p0 = por %p4882_p12, %p4881_p10 }
  0x3e   : > { %p4884_p4 = pnand %p4883_p0, %p4877_p9 }
  0x40   : > { %4887 = shalt.err (!%p4884_p4)
}
  0x41   : > { %4454 = dma.hbm_to_vmem [thread:$0]  (!%p5180_p5), %s211_s18, 16, %s214_s15, %s204_s27  }
  0x42   : > { %222 = sbr.rel (%p5134_p11) target bundleno = 1139 (0x473), region = 36  ;;  %s224_s6 = sand.u32 (!%p5134_p11), 1, %s4988_s19  }
  0x43   : > { %s225_s9 = scalar_lea.sflag (!%p5134_p11), [#allocation3], %s224_s6  ;;  %s227_s12 = scalar_lea.vmem (!%p5134_p11), [#allocation2], %s224_s6 }
  0x47   : > { %4959 = dma.done.wait (%p5118_p3), %s225_s9, 16  }
  0x48   : > { %4961 = vsyncadd (%p5118_p3), %s225_s9, 4294967280 }
  0x49   : > { %4963 = dma.done.wait (%p5109_p1), [#allocation6], 66688  }
  0x4a   : > { %4965 = vsyncadd (%p5109_p1), [#allocation6], 4294900608  ;;  %p263_p2 = scmp.lt.s32.totalorder %s5000_s22, 1  ;;  %v5018_v0 = vmov 0   ;;  %v5019_v1 = vmov 2   ;;  %v5020_v5 = vmov 1   ;;  %v287_v6 = vlaneseq }
  0x4b   : > { %4563 = vset.pattern.permute.xlu0 %v5018_v0  ;;  %4565 = vset.pattern.permute.xlu1 %v5019_v1  ;;  %v3693_v3 = vld [vmem:[%s227_s12] ss:$0 sm:$0xff]  ;;  %p267_p1 = scmp.lt.s32.totalorder %s4996_s21, 1  ;;  %s5021_s11 = smov 126  }
  0x4c   : > { %s264_s15 = scalar_select %p263_p2, %s5000_s22, 1  ;;  %v288_v7 = vshrl.u32 %v287_v6, 7 }
  0x4d   : > { %s268_s28 = scalar_select %p267_p1, %s4996_s21, 1 }
  0x4e   : > { %s3691_s25 = sshll.u32 %s264_s15, 3  ;;  %v289_v8 = vsub.s32 0, %v288_v7  ;;  %v298_v9 = vsub.s32 1, %v288_v7  ;;  %v308_v10 = vsub.s32 2, %v288_v7  ;;  %s5022_s29 = smov 127  }
  0x4f   : > { %s266_s18 = scalar_lea.vmem %s6033_s0, %s3691_s25  ;;  %s3692_s26 = sshll.u32 %s268_s28, 2 }
  0x50   : > { %v273_v2 = vld [vmem:[%s266_s18] sm:$0xff]  ;;  %s270_s27 = scalar_lea.vmem %s6034_s1, %s3692_s26  ;;  %s260_s3 = sand.u32 1, %s4976_s16  }
  0x51   : > { %v281_v4 = vsub.f32 %v273_v2, %v3693_v3  ;;  %v272_v11 = vld [vmem:[%s270_s27] sm:$0x7]  ;;  %s4060_s6 = smul.u32 2084, %s4996_s21  ;;  %s5023_s15 = smov 1  }
  0x52   : > { %v290_v13 = vrot.slane %v272_v11, %v289_v8  ;;  %v299_v14 = vrot.slane %v272_v11, %v298_v9  ;;  %v309_v15 = vrot.slane %v272_v11, %v308_v10  ;;  %s5214_s9 = smul.u32 24, %s260_s3  ;;  %p4054_p3 = scmp.ne.s32.totalorder %s4996_s21, 0 }
  0x53   : > { %284 = vperm.xlu0 %4563, %v281_v4   ;;  %303 = vperm.xlu1 %4565, %v281_v4   ;;  %s5216_s12 = scalar_lea.vmem [#allocation5], %s4060_s6 }
  0x54   : > { %v4567_v40 = vld [vmem:[%s5216_s12 + $0x78] sm:$0xff]   ;;  %v4571_v47 = vld [vmem:[%s5216_s12 + $0x70] sm:$0xff]   ;;  %v4575_v53 = vld [vmem:[%s5216_s12 + $0x68] sm:$0xff]   ;;  %s5959_s25 = scalar_lea.vmem [#allocation7], %s5214_s9 }
  0x55   : > { %v4568_v42 = vld [vmem:[%s5216_s12 + $0xf8] sm:$0xff]   ;;  %4061 = vmatprep.subr.bf16.mxu0 %v4567_v40  ;;  %v4572_v49 = vld [vmem:[%s5216_s12 + $0xf0] sm:$0xff]   ;;  %v4576_v54 = vld [vmem:[%s5216_s12 + $0xe8] sm:$0xff]  }
  0x56   : > { %v4569_v43 = vld [vmem:[%s5216_s12 + $0x38] sm:$0xff]   ;;  %4083 = vmatprep.subr.bf16.mxu1 %v4568_v42  ;;  %v4573_v50 = vld [vmem:[%s5216_s12 + $0x30] sm:$0xff]   ;;  %v4577_v55 = vld [vmem:[%s5216_s12 + $0x28] sm:$0xff]   ;;  %v5024_v42 = vmov 1.0|1.0  }
  0x57   : > { %4564 = vset.pattern.permute.xlu0 %v5020_v5  ;;  %4566 = vset.pattern.permute.xlu1 %v5020_v5  ;;  %v4570_v45 = vld [vmem:[%s5216_s12 + $0xb8] sm:$0xff]   ;;  %v4574_v51 = vld [vmem:[%s5216_s12 + $0xb0] sm:$0xff]   ;;  %v4578_v57 = vld [vmem:[%s5216_s12 + $0xa8] sm:$0xff]  }
  0x58   : > { %293 = vperm.xlu0 %4564, %v281_v4   ;;  %4062 = vmatpush3.bf16.msra.mxu0 %v4569_v43  ;;  %v4579_v58 = vld [vmem:[%s5216_s12 + $0x60] sm:$0xff]   ;;  %v4583_v63 = vld [vmem:[%s5216_s12 + $0x58] sm:$0xff]   ;;  %v4587_v4 = vld [vmem:[%s5216_s12 + $0x50] sm:$0xff]  }
  0x59   : > { %4084 = vmatpush3.bf16.msra.mxu1 %v4570_v45  ;;  %4063 = vmatprep.subr.bf16.mxu0 %v4571_v47  ;;  %v4580_v59 = vld [vmem:[%s5216_s12 + $0xe0] sm:$0xff]   ;;  %v4584_v0 = vld [vmem:[%s5216_s12 + $0xd8] sm:$0xff]   ;;  %v4588_v7 = vld [vmem:[%s5216_s12 + $0xd0] sm:$0xff]  }
  0x5a   : > { %4085 = vmatprep.subr.bf16.mxu1 %v4572_v49  ;;  %v4581_v60 = vld [vmem:[%s5216_s12 + $0x20] sm:$0xff]   ;;  %v4585_v1 = vld [vmem:[%s5216_s12 + $0x18] sm:$0xff]   ;;  %v4589_v9 = vld [vmem:[%s5216_s12 + $0x10] sm:$0xff]  }
  0x5b   : > { %v4582_v62 = vld [vmem:[%s5216_s12 + $0xa0] sm:$0xff]   ;;  %v4586_v3 = vld [vmem:[%s5216_s12 + $0x98] sm:$0xff]   ;;  %v4590_v11 = vld [vmem:[%s5216_s12 + $0x90] sm:$0xff]  }
  0x5c   : > { %4064 = vmatpush3.bf16.msra.mxu0 %v4573_v50  ;;  %v4603_v45 = vld [vmem:[%s5216_s12 + $0x170] sm:$0xff]   ;;  %v4602_v47 = vld [vmem:[%s5216_s12 + $0x1b8] sm:$0xff]   ;;  %v4607_v50 = vld [vmem:[%s5216_s12 + $0x168] sm:$0xff]  }
  0x5d   : > { %4086 = vmatpush3.bf16.msra.mxu1 %v4574_v51  ;;  %4065 = vmatprep.subr.bf16.mxu0 %v4575_v53  ;;  %v4604_v49 = vld [vmem:[%s5216_s12 + $0x1f0] sm:$0xff]   ;;  %v4609_v53 = vld [vmem:[%s5216_s12 + $0x128] sm:$0xff]  }
  0x5e   : > { %4087 = vmatprep.subr.bf16.mxu1 %v4576_v54  ;;  %v4608_v54 = vld [vmem:[%s5216_s12 + $0x1e8] sm:$0xff]  }
  0x60   : > { %4066 = vmatpush3.bf16.msra.mxu0 %v4577_v55  ;;  %v4611_v55 = vld [vmem:[%s5216_s12 + $0x160] sm:$0xff]  }
  0x61   : > { %4088 = vmatpush3.bf16.msra.mxu1 %v4578_v57  ;;  %4067 = vmatprep.subr.bf16.mxu0 %v4579_v58  ;;  %v4610_v57 = vld [vmem:[%s5216_s12 + $0x1a8] sm:$0xff]   ;;  %v4613_v58 = vld [vmem:[%s5216_s12 + $0x120] sm:$0xff]  }
  0x62   : > { %4089 = vmatprep.subr.bf16.mxu1 %v4580_v59  ;;  %v4612_v59 = vld [vmem:[%s5216_s12 + $0x1e0] sm:$0xff]  }
  0x64   : > { %4068 = vmatpush3.bf16.msra.mxu0 %v4581_v60  ;;  %v4615_v60 = vld [vmem:[%s5216_s12 + $0x158] sm:$0xff]  }
  0x65   : > { %4090 = vmatpush3.bf16.msra.mxu1 %v4582_v62  ;;  %4069 = vmatprep.subr.bf16.mxu0 %v4583_v63  ;;  %v4614_v62 = vld [vmem:[%s5216_s12 + $0x1a0] sm:$0xff]   ;;  %v4617_v63 = vld [vmem:[%s5216_s12 + $0x118] sm:$0xff]  }
  0x66   : > { %4091 = vmatprep.subr.bf16.mxu1 %v4584_v0  ;;  %v4616_v0 = vld [vmem:[%s5216_s12 + $0x1d8] sm:$0xff]  }
  0x68   : > { %4070 = vmatpush3.bf16.msra.mxu0 %v4585_v1  ;;  %v4619_v1 = vld [vmem:[%s5216_s12 + $0x150] sm:$0xff]  }
  0x69   : > { %4092 = vmatpush3.bf16.msra.mxu1 %v4586_v3  ;;  %4071 = vmatprep.subr.bf16.mxu0 %v4587_v4  ;;  %v4618_v4 = vld [vmem:[%s5216_s12 + $0x198] sm:$0xff]  }
  0x6a   : > { %4093 = vmatprep.subr.bf16.mxu1 %v4588_v7  ;;  %v4620_v7 = vld [vmem:[%s5216_s12 + $0x1d0] sm:$0xff]  }
  0x6c   : > { %4072 = vmatpush3.bf16.msra.mxu0 %v4589_v9  ;;  %v4659_v9 = vld [vmem:[%s5216_s12 + $0x240] sm:$0xff]  }
  0x6d   : > { %4094 = vmatpush3.bf16.msra.mxu1 %v4590_v11 }
  0xce   : > { %v285_v12 = vpop.permute.xlu0 %284  ;;  %v304_v16 = vpop.permute.xlu1 %303 }
  0xcf   : > { %v291_v18 = vmul.f32 %v290_v13, %v285_v12  ;;  %v310_v20 = vmul.f32 %v309_v15, %v304_v16  ;;  %v4592_v15 = vld [vmem:[%s5216_s12 + $0xc8] sm:$0xff]  }
  0xd0   : > { %4095 = vmatprep.subr.bf16.mxu1 %v4592_v15  ;;  %v4627_v15 = vld [vmem:[%s5216_s12 + $0x140] sm:$0xff]  }
  0xd3   : > { %v294_v17 = vpop.permute.xlu0 %293 }
  0xd4   : > { %v300_v19 = vmul.f32 %v299_v14, %v294_v17  ;;  %v4591_v14 = vld [vmem:[%s5216_s12 + $0x48] sm:$0xff]  }
  0xd5   : > { %4073 = vmatprep.subr.bf16.mxu0 %v4591_v14  ;;  %v4624_v14 = vld [vmem:[%s5216_s12 + $0x1c8] sm:$0xff]  }
  0xd6   : > { %v301_v21 = vadd.f32 %v300_v19, %v291_v18  ;;  %v4593_v19 = vld [vmem:[%s5216_s12 + $0x8] sm:$0xff]  }
  0xd7   : > { %4074 = vmatpush3.bf16.msra.mxu0 %v4593_v19  ;;  %v4665_v19 = vld [vmem:[%s5216_s12 + $0x338] sm:$0xff]  }
  0xd8   : > { %v311_v22 = vadd.f32 %v310_v20, %v301_v21  ;;  %v4594_v20 = vld [vmem:[%s5216_s12 + $0x88] sm:$0xff]  }
  0xd9   : > { %4096 = vmatpush3.bf16.msra.mxu1 %v4594_v20  ;;  %v4626_v20 = vld [vmem:[%s5216_s12 + $0x188] sm:$0xff]  }
  0xda   : > { %v312_v23 = vsub.f32 0.0, %v311_v22 }
  0xdc   : > { %323 = vrot.lane.b32.xlu1 %v312_v23, %s5021_s11 }
  0xe0   : > { %314 = vrot.lane.b32.xlu1 %v312_v23, %s5022_s29 }
 0x14e   : > { %v324_v24 = vpop.permute.xlu1 %323 }
 0x14f   : > { %4828 = vrcp.f32 %v324_v24  ;;  %v4595_v24 = vld [vmem:[%s5216_s12 + $0x40] sm:$0xff]  }
 0x150   : > { %4075 = vmatprep.subr.bf16.mxu0 %v4595_v24  ;;  %v4668_v24 = vld [vmem:[%s5216_s12 + $0x3f0] sm:$0xff]  }
 0x152   : > { %v315_v25 = vpop.permute.xlu1 %314 }
 0x153   : > { %4830 = vrcp.f32 %v315_v25  ;;  %v4596_v25 = vld [vmem:[%s5216_s12 + $0xc0] sm:$0xff]  }
 0x154   : > { %4097 = vmatprep.subr.bf16.mxu1 %v4596_v25 }
 0x15c   : > { %v4829_v26 = vpop.eup %4828 }
 0x15d   : > { %v327_v27 = vmul.f32 %v4829_v26, %v311_v22 }
 0x15f   : > { %v328_v28 = vmul.f32 248.0, %v327_v27 }
 0x160   : > { %v4831_v29 = vpop.eup %4830 }
 0x161   : > { %v329_v30 = vadd.f32 112.0, %v328_v28  ;;  %v318_v31 = vmul.f32 %v4831_v29, %v312_v23  ;;  %v4597_v28 = vld [vmem:[%s5216_s12] sm:$0xff]  }
 0x162   : > { %v4598_v29 = vld [vmem:[%s5216_s12 + $0x80] sm:$0xff]   ;;  %4076 = vmatpush3.bf16.msra.mxu0 %v4597_v28  ;;  %v4632_v28 = vld [vmem:[%s5216_s12 + $0x2f8] sm:$0xff]  }
 0x163   : > { %v330_v32 = vmax.f32 %v329_v30, 0.0  ;;  %v319_v33 = vmul.f32 248.0, %v318_v31  ;;  %4098 = vmatpush3.bf16.msra.mxu1 %v4598_v29  ;;  %v4670_v29 = vld [vmem:[%s5216_s12 + $0x3b0] sm:$0xff]  }
 0x165   : > { %v331_v34 = vmin.f32 %v330_v32, 223.0  ;;  %v320_v36 = vadd.f32 112.0, %v319_v33 }
 0x167   : > { %v334_v35 = vmul.f32 0.25, %v331_v34  ;;  %v321_v39 = vmax.f32 %v320_v36, 0.0  ;;  %v4599_v34 = vld [vmem:[%s5216_s12 + $0x178] sm:$0xff]   ;;  %v5253_v36 = vand.u32 127, %v287_v6 }
 0x168   : > { %4105 = vmatprep.subr.bf16.mxu0 %v4599_v34  ;;  %v4636_v34 = vld [vmem:[%s5216_s12 + $0x2f0] sm:$0xff]  }
 0x169   : > { %v4436_v37 = vtrunc.f32 %v334_v35  ;;  %v322_v46 = vmin.f32 %v321_v39, 223.0  ;;  %v4600_v35 = vld [vmem:[%s5216_s12 + $0x1f8] sm:$0xff]   ;;  %v864_v39 = vadd.s32 384, %v5253_v36  ;;  %v863_v43 = vadd.s32 256, %v5253_v36 }
 0x16a   : > { %4127 = vmatprep.subr.bf16.mxu1 %v4600_v35  ;;  %v868_v51 = vadd.s32 896, %v5253_v36  ;;  %v870_v3 = vadd.s32 1152, %v5253_v36  ;;  %v872_v11 = vadd.s32 1408, %v5253_v36  ;;  %v871_v25 = vadd.s32 1280, %v5253_v36  ;;  %v4637_v35 = vld [vmem:[%s5216_s12 + $0x230] sm:$0xff]  }
 0x16b   : > { %v4437_v38 = vcvt.f32.s32 %v4436_v37  ;;  %v332_v52 = vmul.f32 0.25, %v322_v46  ;;  %v862_v37 = vadd.s32 128, %v5253_v36  ;;  %v866_v46 = vadd.s32 640, %v5253_v36 }
 0x16d   : > { %895 = vrot.lane.b32.xlu0 %v4437_v38, %s5023_s15  ;;  %v935_v41 = vshra.s32 %v4437_v38, 1  ;;  %v1011_v44 = vshra.s32 %v4437_v38, 2  ;;  %v1087_v48 = vshra.s32 %v4437_v38, 3  ;;  %v4434_v56 = vtrunc.f32 %v332_v52  ;;  %v4606_v52 = vld [vmem:[%s5216_s12 + $0x1b0] sm:$0xff]  }
 0x16f   : > { %938 = vrot.lane.b32.xlu1 %v935_v41, %s5023_s15  ;;  %v4435_v61 = vcvt.f32.s32 %v4434_v56  ;;  %v865_v56 = vadd.s32 512, %v5253_v36 }
 0x171   : > { %1014 = vrot.lane.b32.xlu0 %v1011_v44, %s5023_s15  ;;  %v934_v2 = vshra.s32 %v4435_v61, 1  ;;  %v1010_v5 = vshra.s32 %v4435_v61, 2  ;;  %v1086_v8 = vshra.s32 %v4435_v61, 3  ;;  %v894_v12 = vmul.u32 56, %v4435_v61  ;;  %v4601_v44 = vld [vmem:[%s5216_s12 + $0x138] sm:$0xff]  }
 0x172   : > { %v867_v61 = vadd.s32 768, %v5253_v36 }
 0x173   : > { %1090 = vrot.lane.b32.xlu1 %v1087_v48, %s5023_s15  ;;  %v936_v10 = vmul.u32 28, %v934_v2  ;;  %v1012_v13 = vmul.u32 14, %v1010_v5  ;;  %v4605_v48 = vld [vmem:[%s5216_s12 + $0x130] sm:$0xff]   ;;  %v4655_v2 = vld [vmem:[%s5216_s12 + $0x248] sm:$0xff]  }
 0x174   : > { %v1088_v18 = vmul.u32 7, %v1086_v8  ;;  %v4621_v5 = vld [vmem:[%s5216_s12 + $0x110] sm:$0xff]   ;;  %v4623_v8 = vld [vmem:[%s5216_s12 + $0x148] sm:$0xff]  }
 0x175   : > { %v937_v17 = vadd.s32 3136, %v936_v10  ;;  %v1013_v23 = vadd.s32 3920, %v1012_v13  ;;  %v4625_v13 = vld [vmem:[%s5216_s12 + $0x108] sm:$0xff]   ;;  %v877_v10 = vadd.s32 2048, %v5253_v36 }
 0x176   : > { %v1089_v31 = vadd.s32 4116, %v1088_v18  ;;  %v869_v18 = vadd.s32 1024, %v5253_v36 }
 0x1df   : > { %v896_v16 = vpop.permute.xlu0 %895 }
 0x1e0   : > { %v897_v21 = vadd.s32 %v896_v16, %v894_v12  ;;  %v4622_v12 = vld [vmem:[%s5216_s12 + $0x190] sm:$0xff]   ;;  %v879_v16 = vadd.s32 2304, %v5253_v36 }
 0x1e1   : > { %v939_v22 = vpop.permute.xlu1 %938 }
 0x1e2   : > { %v940_v26 = vadd.s32 %v939_v22, %v937_v17  ;;  %899 = vperm.xlu0 %4564, %v897_v21   ;;  %v4629_v21 = vld [vmem:[%s5216_s12 + $0x100] sm:$0xff]  }
 0x1e3   : > { %v1015_v27 = vpop.permute.xlu0 %1014  ;;  %v4628_v22 = vld [vmem:[%s5216_s12 + $0x1c0] sm:$0xff]  }
 0x1e4   : > { %v1016_v30 = vadd.s32 %v1015_v27, %v1013_v23  ;;  %942 = vperm.xlu1 %4566, %v940_v26   ;;  %v4631_v23 = vld [vmem:[%s5216_s12 + $0x278] sm:$0xff]   ;;  %v4630_v26 = vld [vmem:[%s5216_s12 + $0x180] sm:$0xff]  }
 0x1e5   : > { %v1091_v32 = vpop.permute.xlu1 %1090  ;;  %v4633_v27 = vld [vmem:[%s5216_s12 + $0x238] sm:$0xff]   ;;  %v4662_v17 = vld [vmem:[%s5216_s12 + $0x280] sm:$0xff]  }
 0x1e6   : > { %v1092_v33 = vadd.s32 %v1091_v32, %v1089_v31  ;;  %1018 = vperm.xlu0 %4564, %v1016_v30   ;;  %v4635_v31 = vld [vmem:[%s5216_s12 + $0x270] sm:$0xff]   ;;  %v874_v32 = vadd.s32 1664, %v5253_v36  ;;  %v4672_v30 = vld [vmem:[%s5216_s12 + $0x3e8] sm:$0xff]  }
 0x1e8   : > { %1094 = vperm.xlu1 %4566, %v1092_v33   ;;  %v4634_v33 = vld [vmem:[%s5216_s12 + $0x2b8] sm:$0xff]  }
 0x25d   : > { %v5256_v38 = vpop.permute.xlu0 %899 }
 0x25e   : > { %vm902_vm0 = vcmp.eq.s32.totalorder %v862_v37, %v5256_v38  ;;  %vm904_vm4 = vcmp.eq.s32.totalorder %v864_v39, %v5256_v38 }
 0x25f   : > { %v5259_v40 = vpop.permute.xlu1 %942 }
 0x260   : > { %vm945_vm1 = vcmp.eq.s32.totalorder %v862_v37, %v5259_v40  ;;  %vm947_vm2 = vcmp.eq.s32.totalorder %v864_v39, %v5259_v40  ;;  %vm944_vm14 = vcmp.eq.s32.totalorder %v5253_v36, %v5259_v40 }
 0x261   : > { %v5264_v41 = vpop.permute.xlu0 %1018  ;;  %vm978_vm3 = vmor %vm902_vm0, %vm945_vm1 }
 0x262   : > { %vm1021_vm5 = vcmp.eq.s32.totalorder %v862_v37, %v5264_v41  ;;  %vm980_vm6 = vmor %vm904_vm4, %vm947_vm2  ;;  %vm1023_vm7 = vcmp.eq.s32.totalorder %v864_v39, %v5264_v41  ;;  %vm1020_vm0 = vcmp.eq.s32.totalorder %v5253_v36, %v5264_v41  ;;  %vm901_vm2 = vcmp.eq.s32.totalorder %v5253_v36, %v5256_v38 }
 0x263   : > { %v5269_v6 = vpop.permute.xlu1 %1094  ;;  %vm1054_vm8 = vmor %vm978_vm3, %vm1021_vm5 }
 0x264   : > { %vm1097_vm9 = vcmp.eq.s32.totalorder %v862_v37, %v5269_v6  ;;  %vm1056_vm10 = vmor %vm980_vm6, %vm1023_vm7  ;;  %vm1099_vm11 = vcmp.eq.s32.totalorder %v864_v39, %v5269_v6  ;;  %vm1096_vm3 = vcmp.eq.s32.totalorder %v5253_v36, %v5269_v6  ;;  %vm946_vm6 = vcmp.eq.s32.totalorder %v863_v43, %v5259_v40  ;;  %v4639_v39 = vld [vmem:[%s5216_s12 + $0x268] sm:$0xff]   ;;  %v4676_v37 = vld [vmem:[%s5216_s12 + $0x3e0] sm:$0xff]  }
 0x265   : > { %vm1130_vm12 = vmor %vm1054_vm8, %vm1097_vm9  ;;  %vm1022_vm8 = vcmp.eq.s32.totalorder %v863_v43, %v5264_v41 }
 0x266   : > { %vm3989_vm13 = vmpackc.low %vm1130_vm12, %vm1130_vm12 }
 0x267   : > { %3990 = vmatprep.mubr.msk.bf16.mxu0 %vm3989_vm13, %v5024_v42  ;;  %vm1132_vm15 = vmor %vm1056_vm10, %vm1099_vm11  ;;  %vm903_vm10 = vcmp.eq.s32.totalorder %v863_v43, %v5256_v38  ;;  %vm1098_vm11 = vcmp.eq.s32.totalorder %v863_v43, %v5269_v6  ;;  %v876_v43 = vadd.s32 1920, %v5253_v36 }
 0x268   : > { %vm3993_vm1 = vmpackc.low %vm1132_vm15, %vm1132_vm15 }
 0x269   : > { %3994 = vmatprep.mubr.msk.bf16.mxu1 %vm3993_vm1, %v5024_v42  ;;  %vm977_vm4 = vmor %vm901_vm2, %vm944_vm14  ;;  %vm949_vm14 = vcmp.eq.s32.totalorder %v866_v46, %v5259_v40  ;;  %vm906_vm2 = vcmp.eq.s32.totalorder %v866_v46, %v5256_v38 }
 0x26a   : > { %vm1053_vm5 = vmor %vm977_vm4, %vm1020_vm0  ;;  %vm1025_vm0 = vcmp.eq.s32.totalorder %v866_v46, %v5264_v41 }
 0x26b   : > { %vm1129_vm7 = vmor %vm1053_vm5, %vm1096_vm3  ;;  %vm1101_vm3 = vcmp.eq.s32.totalorder %v866_v46, %v5269_v6  ;;  %v4641_v46 = vld [vmem:[%s5216_s12 + $0x228] sm:$0xff]  }
 0x26c   : > { %vm3991_vm9 = vmpackc.low %vm1129_vm7, %vm1129_vm7 }
 0x26d   : > { %3992 = vmatmul.mubr.msk.bf16.vlgmr.msra.gmra.mxu0 %vm3991_vm9, %v5024_v42  ;;  %vm979_vm12 = vmor %vm903_vm10, %vm946_vm6  ;;  %vm951_vm6 = vcmp.eq.s32.totalorder %v868_v51, %v5259_v40  ;;  %vm908_vm10 = vcmp.eq.s32.totalorder %v868_v51, %v5256_v38 }
 0x26e   : > { %vm1055_vm13 = vmor %vm979_vm12, %vm1022_vm8  ;;  %4106 = vmatpush3.bf16.msra.mxu0 %v4601_v44  ;;  %vm1027_vm8 = vcmp.eq.s32.totalorder %v868_v51, %v5264_v41  ;;  %v4638_v44 = vld [vmem:[%s5216_s12 + $0x2b0] sm:$0xff]  }
 0x26f   : > { %vm1131_vm15 = vmor %vm1055_vm13, %vm1098_vm11  ;;  %4107 = vmatprep.subr.bf16.mxu0 %v4603_v45  ;;  %vm1103_vm11 = vcmp.eq.s32.totalorder %v868_v51, %v5269_v6  ;;  %v4640_v45 = vld [vmem:[%s5216_s12 + $0x2e8] sm:$0xff]   ;;  %v4644_v51 = vld [vmem:[%s5216_s12 + $0x2e0] sm:$0xff]  }
 0x270   : > { %vm3995_vm1 = vmpackc.low %vm1131_vm15, %vm1131_vm15 }
 0x271   : > { %3996 = vmatmul.mubr.msk.bf16.vlgmr.msra.gmra.mxu1 %vm3995_vm1, %v5024_v42  ;;  %vm982_vm4 = vmor %vm906_vm2, %vm949_vm14  ;;  %vm948_vm14 = vcmp.eq.s32.totalorder %v865_v56, %v5259_v40  ;;  %vm905_vm1 = vcmp.eq.s32.totalorder %v865_v56, %v5256_v38 }
 0x272   : > { %4128 = vmatpush3.bf16.msra.mxu1 %v4602_v47  ;;  %vm1058_vm5 = vmor %vm982_vm4, %vm1025_vm0  ;;  %4108 = vmatpush3.bf16.msra.mxu0 %v4605_v48  ;;  %vm950_vm4 = vcmp.eq.s32.totalorder %v867_v61, %v5259_v40  ;;  %v4643_v48 = vld [vmem:[%s5216_s12 + $0x260] sm:$0xff]   ;;  %v4680_v47 = vld [vmem:[%s5216_s12 + $0x3d8] sm:$0xff]  }
 0x273   : > { %vm1134_vm7 = vmor %vm1058_vm5, %vm1101_vm3  ;;  %4129 = vmatprep.subr.bf16.mxu1 %v4604_v49  ;;  %4109 = vmatprep.subr.bf16.mxu0 %v4607_v50  ;;  %vm1024_vm3 = vcmp.eq.s32.totalorder %v865_v56, %v5264_v41  ;;  %v873_v49 = vadd.s32 1536, %v5253_v36  ;;  %v4642_v50 = vld [vmem:[%s5216_s12 + $0x2a8] sm:$0xff]  }
 0x274   : > { %vm3997_vm9 = vmpackc.low %vm1134_vm7, %vm1134_vm7  ;;  %vm907_vm7 = vcmp.eq.s32.totalorder %v867_v61, %v5256_v38 }
 0x275   : > { %3998 = vmatprep.mubr.msk.bf16.mxu0 %vm3997_vm9, %v5024_v42  ;;  %vm984_vm12 = vmor %vm908_vm10, %vm951_vm6  ;;  %vm1100_vm6 = vcmp.eq.s32.totalorder %v865_v56, %v5269_v6  ;;  %vm1026_vm9 = vcmp.eq.s32.totalorder %v867_v61, %v5264_v41  ;;  %vm953_vm10 = vcmp.eq.s32.totalorder %v870_v3, %v5259_v40  ;;  %v4646_v56 = vld [vmem:[%s5216_s12 + $0x2a0] sm:$0xff]  }
 0x276   : > { %vm1060_vm13 = vmor %vm984_vm12, %vm1027_vm8  ;;  %4130 = vmatpush3.bf16.msra.mxu1 %v4606_v52  ;;  %4110 = vmatpush3.bf16.msra.mxu0 %v4609_v53  ;;  %vm1029_vm12 = vcmp.eq.s32.totalorder %v870_v3, %v5264_v41  ;;  %v4645_v52 = vld [vmem:[%s5216_s12 + $0x220] sm:$0xff]   ;;  %v4684_v53 = vld [vmem:[%s5216_s12 + $0x3d0] sm:$0xff]  }
 0x277   : > { %vm1136_vm15 = vmor %vm1060_vm13, %vm1103_vm11  ;;  %4131 = vmatprep.subr.bf16.mxu1 %v4608_v54  ;;  %4111 = vmatprep.subr.bf16.mxu0 %v4611_v55  ;;  %v4647_v54 = vld [vmem:[%s5216_s12 + $0x258] sm:$0xff]   ;;  %v875_v55 = vadd.s32 1792, %v5253_v36 }
 0x278   : > { %vm4001_vm0 = vmpackc.low %vm1136_vm15, %vm1136_vm15  ;;  %vm910_vm15 = vcmp.eq.s32.totalorder %v870_v3, %v5256_v38 }
 0x279   : > { %4002 = vmatprep.mubr.msk.bf16.mxu1 %vm4001_vm0, %v5024_v42  ;;  %vm981_vm2 = vmor %vm905_vm1, %vm948_vm14  ;;  %vm1102_vm14 = vcmp.eq.s32.totalorder %v867_v61, %v5269_v6  ;;  %vm1105_vm1 = vcmp.eq.s32.totalorder %v870_v3, %v5269_v6  ;;  %v878_v61 = vadd.s32 2176, %v5253_v36  ;;  %v880_v3 = vadd.s32 2432, %v5253_v36 }
 0x27a   : > { %4132 = vmatpush3.bf16.msra.mxu1 %v4610_v57  ;;  %4112 = vmatpush3.bf16.msra.mxu0 %v4613_v58  ;;  %vm5328_vm5 = vmor %vm981_vm2, %vm1024_vm3  ;;  %vm955_vm3 = vcmp.eq.s32.totalorder %v872_v11, %v5259_v40  ;;  %v4648_v57 = vld [vmem:[%s5216_s12 + $0x2d8] sm:$0xff]  }
 0x27b   : > { %4133 = vmatprep.subr.bf16.mxu1 %v4612_v59  ;;  %4113 = vmatprep.subr.bf16.mxu0 %v4615_v60  ;;  %vm983_vm8 = vmor %vm907_vm7, %vm950_vm4  ;;  %v4649_v58 = vld [vmem:[%s5216_s12 + $0x218] sm:$0xff]   ;;  %v4651_v60 = vld [vmem:[%s5216_s12 + $0x250] sm:$0xff]  }
 0x27c   : > { %vm5343_vm11 = vmor %vm5328_vm5, %vm1100_vm6  ;;  %vm912_vm6 = vcmp.eq.s32.totalorder %v872_v11, %v5256_v38  ;;  %v4703_v59 = vld [vmem:[%s5216_s12 + $0x468] sm:$0xff]  }
 0x27d   : > { %vm5348_vm13 = vmor %vm983_vm8, %vm1026_vm9  ;;  %vm1031_vm8 = vcmp.eq.s32.totalorder %v872_v11, %v5264_v41 }
 0x27e   : > { %4134 = vmatpush3.bf16.msra.mxu1 %v4614_v62  ;;  %4114 = vmatpush3.bf16.msra.mxu0 %v4617_v63  ;;  %vm986_vm0 = vmor %vm910_vm15, %vm953_vm10  ;;  %vm952_vm10 = vcmp.eq.s32.totalorder %v869_v18, %v5259_v40  ;;  %v4650_v62 = vld [vmem:[%s5216_s12 + $0x298] sm:$0xff]   ;;  %v4652_v63 = vld [vmem:[%s5216_s12 + $0x2d0] sm:$0xff]  }
 0x27f   : > { %4135 = vmatprep.subr.bf16.mxu1 %v4616_v0  ;;  %4115 = vmatprep.subr.bf16.mxu0 %v4619_v1  ;;  %vm1062_vm2 = vmor %vm986_vm0, %vm1029_vm12  ;;  %vm909_vm0 = vcmp.eq.s32.totalorder %v869_v18, %v5256_v38  ;;  %v4653_v0 = vld [vmem:[%s5216_s12 + $0x210] sm:$0xff]  }
 0x280   : > { %vm5365_vm4 = vmor %vm5348_vm13, %vm1102_vm14  ;;  %vm1028_vm13 = vcmp.eq.s32.totalorder %v869_v18, %v5264_v41  ;;  %vm1030_vm14 = vcmp.eq.s32.totalorder %v871_v25, %v5264_v41 }
 0x281   : > { %vm5369_vm5 = vmor %vm1062_vm2, %vm1105_vm1  ;;  %vm1104_vm1 = vcmp.eq.s32.totalorder %v869_v18, %v5269_v6  ;;  %vm1107_vm2 = vcmp.eq.s32.totalorder %v872_v11, %v5269_v6  ;;  %v4658_v11 = vld [vmem:[%s5216_s12 + $0x288] sm:$0xff]   ;;  %v4664_v18 = vld [vmem:[%s5216_s12 + $0x3f8] sm:$0xff]  }
 0x282   : > { %4136 = vmatpush3.bf16.msra.mxu1 %v4618_v4  ;;  %4116 = vmatpush3.bf16.msra.mxu0 %v4621_v5  ;;  %vm5375_vm7 = vmor %vm912_vm6, %vm955_vm3  ;;  %v4654_v4 = vld [vmem:[%s5216_s12 + $0x290] sm:$0xff]   ;;  %v4656_v5 = vld [vmem:[%s5216_s12 + $0x2c8] sm:$0xff]  }
 0x283   : > { %4137 = vmatprep.subr.bf16.mxu1 %v4620_v7  ;;  %4117 = vmatprep.subr.bf16.mxu0 %v4623_v8  ;;  %vm3999_vm9 = vmpackc.low %vm5343_vm11, %vm5343_vm11  ;;  %v4657_v7 = vld [vmem:[%s5216_s12 + $0x208] sm:$0xff]   ;;  %v6089_v8 = vmov 0 }
 0x284   : > { %vm4005_vm12 = vmpackc.low %vm5369_vm5, %vm5369_vm5  ;;  %vm914_vm5 = vcmp.eq.s32.totalorder %v874_v32, %v5256_v38 }
 0x285   : > { %vm5397_vm15 = vmor %vm5375_vm7, %vm1031_vm8  ;;  %vm954_vm7 = vcmp.eq.s32.totalorder %v871_v25, %v5259_v40 }
 0x286   : > { %4138 = vmatpush3.bf16.msra.mxu1 %v4622_v12  ;;  %4118 = vmatpush3.bf16.msra.mxu0 %v4625_v13  ;;  %vm985_vm3 = vmor %vm909_vm0, %vm952_vm10  ;;  %vm1106_vm0 = vcmp.eq.s32.totalorder %v871_v25, %v5269_v6  ;;  %v4660_v12 = vld [vmem:[%s5216_s12 + $0x2c0] sm:$0xff]  }
 0x287   : > { %4139 = vmatprep.subr.bf16.mxu1 %v4624_v14  ;;  %4119 = vmatprep.subr.bf16.mxu0 %v4627_v15  ;;  %vm1061_vm6 = vmor %vm985_vm3, %vm1028_vm13  ;;  %vm911_vm13 = vcmp.eq.s32.totalorder %v871_v25, %v5256_v38  ;;  %v4661_v13 = vld [vmem:[%s5216_s12 + $0x200] sm:$0xff]   ;;  %v4663_v15 = vld [vmem:[%s5216_s12 + $0x378] sm:$0xff]  }
 0x288   : > { %vm5409_vm8 = vmor %vm1061_vm6, %vm1104_vm1  ;;  %v4669_v25 = vld [vmem:[%s5216_s12 + $0x330] sm:$0xff]   ;;  %v4704_v14 = vld [vmem:[%s5216_s12 + $0x4e8] sm:$0xff]  }
 0x289   : > { %vm5416_vm10 = vmor %vm5397_vm15, %vm1107_vm2  ;;  %vm957_vm2 = vcmp.eq.s32.totalorder %v874_v32, %v5259_v40 }
 0x28a   : > { %4140 = vmatpush3.bf16.msra.mxu1 %v4626_v20  ;;  %4120 = vmatpush3.bf16.msra.mxu0 %v4629_v21  ;;  %vm987_vm1 = vmor %vm911_vm13, %vm954_vm7  ;;  %v6093_v20 = vmov 0  ;;  %v4667_v21 = vld [vmem:[%s5216_s12 + $0x370] sm:$0xff]  }
 0x28b   : > { %4141 = vmatprep.subr.bf16.mxu1 %v4628_v22  ;;  %4149 = vmatprep.subr.bf16.mxu0 %v4631_v23  ;;  %vm1063_vm15 = vmor %vm987_vm1, %vm1030_vm14  ;;  %vm1111_vm1 = vcmp.eq.s32.totalorder %v876_v43, %v5269_v6  ;;  %v882_v22 = vadd.s32 2688, %v5253_v36  ;;  %v4666_v23 = vld [vmem:[%s5216_s12 + $0x3b8] sm:$0xff]  }
 0x28c   : > { %vm5440_vm11 = vmor %vm1063_vm15, %vm1106_vm0  ;;  %vm916_vm0 = vcmp.eq.s32.totalorder %v876_v43, %v5256_v38 }
 0x28d   : > { %4000 = vmatmul.mubr.msk.bf16.vlgmr.msra.gmra.mxu0 %vm3999_vm9, %v5024_v42  ;;  %vm1033_vm9 = vcmp.eq.s32.totalorder %v874_v32, %v5264_v41  ;;  %vm4009_vm14 = vmpackc.low %vm5416_vm10, %vm5416_vm10  ;;  %vm959_vm10 = vcmp.eq.s32.totalorder %v876_v43, %v5259_v40 }
 0x28e   : > { %4142 = vmatpush3.bf16.msra.mxu1 %v4630_v26  ;;  %4150 = vmatpush3.bf16.msra.mxu0 %v4633_v27  ;;  %vm6080_vm3 = vmpackc.low %vm5365_vm4, %vm5365_vm4  ;;  %vm1035_vm4 = vcmp.eq.s32.totalorder %v876_v43, %v5264_v41  ;;  %v4671_v27 = vld [vmem:[%s5216_s12 + $0x368] sm:$0xff]   ;;  %v4734_v26 = vld [vmem:[%s5216_s12 + $0x5b0] sm:$0xff]  }
 0x28f   : > { %4171 = vmatprep.subr.bf16.mxu1 %v4632_v28  ;;  %4006 = vmatprep.mubr.msk.bf16.mxu0 %vm4005_vm12, %v5024_v42  ;;  %vm1109_vm12 = vcmp.eq.s32.totalorder %v874_v32, %v5269_v6  ;;  %vm990_vm6 = vmor %vm914_vm5, %vm957_vm2  ;;  %vm1032_vm5 = vcmp.eq.s32.totalorder %v873_v49, %v5264_v41  ;;  %v884_v28 = vadd.s32 2944, %v5253_v36  ;;  %v4736_v32 = vld [vmem:[%s5216_s12 + $0x5e8] sm:$0xff]  }
 0x290   : > { %4151 = vmatprep.subr.bf16.mxu0 %v4635_v31  ;;  %vm1066_vm7 = vmor %vm990_vm6, %vm1033_vm9  ;;  %vm956_vm9 = vcmp.eq.s32.totalorder %v873_v49, %v5259_v40  ;;  %v4673_v31 = vld [vmem:[%s5216_s12 + $0x328] sm:$0xff]  }
 0x291   : > { %4004 = vmatmul.mubr.msk.bf16.vlgmr.msra.gmra.mxu1 %vm6080_vm3, %v5024_v42  ;;  %vm5463_vm13 = vmor %vm1066_vm7, %vm1109_vm12  ;;  %vm913_vm12 = vcmp.eq.s32.totalorder %v873_v49, %v5256_v38  ;;  %vm1108_vm3 = vcmp.eq.s32.totalorder %v873_v49, %v5269_v6  ;;  %v6104_v49 = vmov 0  ;;  %v4738_v43 = vld [vmem:[%s5216_s12 + $0x5a8] sm:$0xff]  }
 0x292   : > { %4172 = vmatpush3.bf16.msra.mxu1 %v4634_v33  ;;  %4010 = vmatprep.mubr.msk.bf16.mxu1 %vm4009_vm14, %v5024_v42  ;;  %vm992_vm15 = vmor %vm916_vm0, %vm959_vm10  ;;  %vm958_vm10 = vcmp.eq.s32.totalorder %v875_v55, %v5259_v40  ;;  %vm1034_vm0 = vcmp.eq.s32.totalorder %v875_v55, %v5264_v41  ;;  %v4675_v33 = vld [vmem:[%s5216_s12 + $0x360] sm:$0xff]  }
 0x293   : > { %4173 = vmatprep.subr.bf16.mxu1 %v4636_v34  ;;  %4152 = vmatpush3.bf16.msra.mxu0 %v4637_v35  ;;  %vm1068_vm2 = vmor %vm992_vm15, %vm1035_vm4  ;;  %vm1110_vm15 = vcmp.eq.s32.totalorder %v875_v55, %v5269_v6  ;;  %v881_v34 = vadd.s32 2560, %v5253_v36  ;;  %v4674_v35 = vld [vmem:[%s5216_s12 + $0x3a8] sm:$0xff]  }
 0x294   : > { %4153 = vmatprep.subr.bf16.mxu0 %v4639_v39  ;;  %vm5476_vm14 = vmor %vm1068_vm2, %vm1111_vm1  ;;  %vm915_vm1 = vcmp.eq.s32.totalorder %v875_v55, %v5256_v38  ;;  %v4677_v39 = vld [vmem:[%s5216_s12 + $0x320] sm:$0xff]   ;;  %v6106_v55 = vmov 0 }
 0x295   : > { %vm989_vm6 = vmor %vm913_vm12, %vm956_vm9 }
 0x296   : > { %4174 = vmatpush3.bf16.msra.mxu1 %v4638_v44  ;;  %vm1065_vm7 = vmor %vm989_vm6, %vm1032_vm5  ;;  %vm961_vm5 = vcmp.eq.s32.totalorder %v878_v61, %v5259_v40  ;;  %vm918_vm6 = vcmp.eq.s32.totalorder %v878_v61, %v5256_v38  ;;  %v4679_v44 = vld [vmem:[%s5216_s12 + $0x358] sm:$0xff]  }
 0x297   : > { %4175 = vmatprep.subr.bf16.mxu1 %v4640_v45  ;;  %4154 = vmatpush3.bf16.msra.mxu0 %v4641_v46  ;;  %vm5489_vm4 = vmor %vm1065_vm7, %vm1108_vm3  ;;  %vm1037_vm3 = vcmp.eq.s32.totalorder %v878_v61, %v5264_v41  ;;  %vm1113_vm7 = vcmp.eq.s32.totalorder %v878_v61, %v5269_v6  ;;  %v883_v45 = vadd.s32 2816, %v5253_v36  ;;  %v4678_v46 = vld [vmem:[%s5216_s12 + $0x3a0] sm:$0xff]   ;;  %v4689_v61 = vld [vmem:[%s5216_s12 + $0x308] sm:$0xff]  }
 0x298   : > { %4155 = vmatprep.subr.bf16.mxu0 %v4643_v48  ;;  %vm991_vm2 = vmor %vm915_vm1, %vm958_vm10  ;;  %vm963_vm1 = vcmp.eq.s32.totalorder %v880_v3, %v5259_v40  ;;  %v4681_v48 = vld [vmem:[%s5216_s12 + $0x318] sm:$0xff]  }
 0x299   : > { %vm1067_vm9 = vmor %vm991_vm2, %vm1034_vm0  ;;  %vm1039_vm2 = vcmp.eq.s32.totalorder %v880_v3, %v5264_v41 }
 0x29a   : > { %4176 = vmatpush3.bf16.msra.mxu1 %v4642_v50  ;;  %vm5502_vm12 = vmor %vm1067_vm9, %vm1110_vm15  ;;  %vm920_vm9 = vcmp.eq.s32.totalorder %v880_v3, %v5256_v38  ;;  %v4683_v50 = vld [vmem:[%s5216_s12 + $0x350] sm:$0xff]  }
 0x29b   : > { %4177 = vmatprep.subr.bf16.mxu1 %v4644_v51  ;;  %4156 = vmatpush3.bf16.msra.mxu0 %v4645_v52  ;;  %vm994_vm10 = vmor %vm918_vm6, %vm961_vm5  ;;  %vm1115_vm5 = vcmp.eq.s32.totalorder %v880_v3, %v5269_v6  ;;  %v886_v51 = vadd.s32 3200, %v5253_v36  ;;  %v4682_v52 = vld [vmem:[%s5216_s12 + $0x398] sm:$0xff]   ;;  %v4692_v3 = vld [vmem:[%s5216_s12 + $0x3c0] sm:$0xff]  }
 0x29c   : > { %4157 = vmatprep.subr.bf16.mxu0 %v4647_v54  ;;  %vm1070_vm0 = vmor %vm994_vm10, %vm1037_vm3  ;;  %vm960_vm10 = vcmp.eq.s32.totalorder %v877_v10, %v5259_v40  ;;  %vm1038_vm3 = vcmp.eq.s32.totalorder %v879_v16, %v5264_v41  ;;  %v4685_v54 = vld [vmem:[%s5216_s12 + $0x310] sm:$0xff]  }
 0x29d   : > { %vm5515_vm15 = vmor %vm1070_vm0, %vm1113_vm7 }
 0x29e   : > { %4178 = vmatpush3.bf16.msra.mxu1 %v4646_v56  ;;  %v6090_v8 = vsel %vm5515_vm15, 4294967295, %v6089_v8  ;;  %vm996_vm6 = vmor %vm920_vm9, %vm963_vm1  ;;  %vm1036_vm15 = vcmp.eq.s32.totalorder %v877_v10, %v5264_v41  ;;  %vm1112_vm9 = vcmp.eq.s32.totalorder %v877_v10, %v5269_v6  ;;  %v4687_v56 = vld [vmem:[%s5216_s12 + $0x348] sm:$0xff]  }
 0x29f   : > { %4179 = vmatprep.subr.bf16.mxu1 %v4648_v57  ;;  %4158 = vmatpush3.bf16.msra.mxu0 %v4649_v58  ;;  %vm1072_vm7 = vmor %vm996_vm6, %vm1039_vm2  ;;  %vm917_vm2 = vcmp.eq.s32.totalorder %v877_v10, %v5256_v38  ;;  %v888_v57 = vadd.s32 3456, %v5253_v36  ;;  %v4686_v58 = vld [vmem:[%s5216_s12 + $0x390] sm:$0xff]   ;;  %v4694_v10 = vld [vmem:[%s5216_s12 + $0x380] sm:$0xff]  }
 0x2a0   : > { %4159 = vmatprep.subr.bf16.mxu0 %v4651_v60  ;;  %vm5531_vm0 = vmor %vm1072_vm7, %vm1115_vm5  ;;  %vm962_vm7 = vcmp.eq.s32.totalorder %v879_v16, %v5259_v40  ;;  %v4688_v60 = vld [vmem:[%s5216_s12 + $0x3c8] sm:$0xff]  }
 0x2a1   : > { %vm993_vm5 = vmor %vm917_vm2, %vm960_vm10  ;;  %vm919_vm10 = vcmp.eq.s32.totalorder %v879_v16, %v5256_v38  ;;  %vm1114_vm2 = vcmp.eq.s32.totalorder %v879_v16, %v5269_v6  ;;  %v890_v16 = vadd.s32 3712, %v5253_v36 }
 0x2a2   : > { %4180 = vmatpush3.bf16.msra.mxu1 %v4650_v62  ;;  %vm1069_vm6 = vmor %vm993_vm5, %vm1036_vm15  ;;  %vm965_vm15 = vcmp.eq.s32.totalorder %v882_v22, %v5259_v40  ;;  %v6108_v62 = vmov 0 }
 0x2a3   : > { %4181 = vmatprep.subr.bf16.mxu1 %v4652_v63  ;;  %4160 = vmatpush3.bf16.msra.mxu0 %v4653_v0  ;;  %vm5547_vm1 = vmor %vm1069_vm6, %vm1112_vm9  ;;  %v4691_v63 = vld [vmem:[%s5216_s12 + $0x340] sm:$0xff]   ;;  %v885_v0 = vadd.s32 3072, %v5253_v36 }
 0x2a4   : > { %4161 = vmatprep.subr.bf16.mxu0 %v4655_v2  ;;  %v6094_v20 = vsel %vm5547_vm1, 4294967295, %v6093_v20  ;;  %vm995_vm9 = vmor %vm919_vm10, %vm962_vm7  ;;  %vm1041_vm7 = vcmp.eq.s32.totalorder %v882_v22, %v5264_v41  ;;  %vm922_vm10 = vcmp.eq.s32.totalorder %v882_v22, %v5256_v38  ;;  %v4690_v2 = vld [vmem:[%s5216_s12 + $0x388] sm:$0xff]  }
 0x2a5   : > { %vm6095_vm5 = vmpackc.low %vm5409_vm8, %vm5409_vm8 }
 0x2a6   : > { %4182 = vmatpush3.bf16.msra.mxu1 %v4654_v4  ;;  %vm1071_vm6 = vmor %vm995_vm9, %vm1038_vm3  ;;  %v4693_v4 = vld [vmem:[%s5216_s12 + $0x300] sm:$0xff]  }
 0x2a7   : > { %4183 = vmatprep.subr.bf16.mxu1 %v4656_v5  ;;  %4162 = vmatpush3.bf16.msra.mxu0 %v4657_v7  ;;  %vm5569_vm1 = vmor %vm1071_vm6, %vm1114_vm2  ;;  %vm1117_vm2 = vcmp.eq.s32.totalorder %v882_v22, %v5269_v6  ;;  %v6110_v5 = vmov 0  ;;  %v4695_v7 = vld [vmem:[%s5216_s12 + $0x478] sm:$0xff]   ;;  %v892_v22 = vadd.s32 3968, %v5253_v36 }
 0x2a8   : > { %4163 = vmatprep.subr.bf16.mxu0 %v4659_v9  ;;  %vm6098_vm8 = vmpackc.low %vm5463_vm13, %vm5463_vm13  ;;  %v887_v9 = vadd.s32 3328, %v5253_v36 }
 0x2a9   : > { %vm4017_vm3 = vmpackc.low %vm5476_vm14, %vm5476_vm14 }
 0x2aa   : > { %4184 = vmatpush3.bf16.msra.mxu1 %v4658_v11  ;;  %vm6099_vm13 = vmpackc.low %vm5440_vm11, %vm5440_vm11  ;;  %vm1043_vm11 = vcmp.eq.s32.totalorder %v884_v28, %v5264_v41  ;;  %v4696_v11 = vld [vmem:[%s5216_s12 + $0x4f8] sm:$0xff]  }
 0x2ab   : > { %4185 = vmatprep.subr.bf16.mxu1 %v4660_v12  ;;  %4164 = vmatpush3.bf16.msra.mxu0 %v4661_v13  ;;  %vm998_vm14 = vmor %vm922_vm10, %vm965_vm15  ;;  %vm924_vm15 = vcmp.eq.s32.totalorder %v884_v28, %v5256_v38  ;;  %vm964_vm10 = vcmp.eq.s32.totalorder %v881_v34, %v5259_v40  ;;  %v4697_v12 = vld [vmem:[%s5216_s12 + $0x438] sm:$0xff]   ;;  %v6112_v13 = vmov 0 }
 0x2ac   : > { %4193 = vmatprep.subr.bf16.mxu0 %v4663_v15  ;;  %vm1074_vm9 = vmor %vm998_vm14, %vm1041_vm7  ;;  %vm1119_vm7 = vcmp.eq.s32.totalorder %v884_v28, %v5269_v6  ;;  %vm921_vm14 = vcmp.eq.s32.totalorder %v881_v34, %v5256_v38  ;;  %v4699_v15 = vld [vmem:[%s5216_s12 + $0x470] sm:$0xff]  }
 0x2ad   : > { %vm5600_vm6 = vmor %vm1074_vm9, %vm1117_vm2  ;;  %vm1116_vm9 = vcmp.eq.s32.totalorder %v881_v34, %v5269_v6 }
 0x2ae   : > { %4186 = vmatpush3.bf16.msra.mxu1 %v4662_v17  ;;  %4008 = vmatmul.mubr.msk.bf16.vlgmr.msra.gmra.mxu0 %vm6095_vm5, %v5024_v42  ;;  %vm967_vm5 = vcmp.eq.s32.totalorder %v884_v28, %v5259_v40  ;;  %v4698_v17 = vld [vmem:[%s5216_s12 + $0x4b8] sm:$0xff]   ;;  %v4708_v28 = vld [vmem:[%s5216_s12 + $0x4e0] sm:$0xff]  }
 0x2af   : > { %4215 = vmatprep.subr.bf16.mxu1 %v4664_v18  ;;  %4194 = vmatpush3.bf16.msra.mxu0 %v4665_v19  ;;  %v4700_v18 = vld [vmem:[%s5216_s12 + $0x4f0] sm:$0xff]  }
 0x2b0   : > { %4014 = vmatprep.mubr.msk.bf16.mxu0 %vm6098_vm8, %v5024_v42  ;;  %4195 = vmatprep.subr.bf16.mxu0 %v4667_v21  ;;  %vm1000_vm8 = vmor %vm924_vm15, %vm967_vm5  ;;  %vm966_vm15 = vcmp.eq.s32.totalorder %v883_v45, %v5259_v40  ;;  %v4701_v19 = vld [vmem:[%s5216_s12 + $0x430] sm:$0xff]  }
 0x2b1   : > { %4012 = vmatmul.mubr.msk.bf16.vlgmr.msra.gmra.mxu1 %vm6099_vm13, %v5024_v42  ;;  %vm1040_vm13 = vcmp.eq.s32.totalorder %v881_v34, %v5264_v41  ;;  %vm997_vm5 = vmor %vm921_vm14, %vm964_vm10  ;;  %vm1118_vm10 = vcmp.eq.s32.totalorder %v883_v45, %v5269_v6  ;;  %v4710_v34 = vld [vmem:[%s5216_s12 + $0x4a0] sm:$0xff]   ;;  %v4798_v21 = vld [vmem:[%s5216_s12 + $0x7b0] sm:$0xff]  }
 0x2b2   : > { %4216 = vmatpush3.bf16.msra.mxu1 %v4666_v23  ;;  %4018 = vmatprep.mubr.msk.bf16.mxu1 %vm4017_vm3, %v5024_v42  ;;  %vm1076_vm3 = vmor %vm1000_vm8, %vm1043_vm11  ;;  %vm1042_vm8 = vcmp.eq.s32.totalorder %v883_v45, %v5264_v41  ;;  %v4705_v23 = vld [vmem:[%s5216_s12 + $0x428] sm:$0xff]  }
 0x2b3   : > { %4217 = vmatprep.subr.bf16.mxu1 %v4668_v24  ;;  %4196 = vmatpush3.bf16.msra.mxu0 %v4669_v25  ;;  %vm5613_vm2 = vmor %vm1076_vm3, %vm1119_vm7  ;;  %vm923_vm3 = vcmp.eq.s32.totalorder %v883_v45, %v5256_v38  ;;  %v4707_v24 = vld [vmem:[%s5216_s12 + $0x460] sm:$0xff]   ;;  %v889_v25 = vadd.s32 3584, %v5253_v36  ;;  %v893_v45 = vadd.s32 4096, %v5253_v36 }
 0x2b4   : > { %4197 = vmatprep.subr.bf16.mxu0 %v4671_v27  ;;  %vm1073_vm11 = vmor %vm997_vm5, %vm1040_vm13  ;;  %v4706_v27 = vld [vmem:[%s5216_s12 + $0x4a8] sm:$0xff]  }
 0x2b5   : > { %vm5626_vm7 = vmor %vm1073_vm11, %vm1116_vm9  ;;  %vm969_vm9 = vcmp.eq.s32.totalorder %v886_v51, %v5259_v40  ;;  %vm1045_vm11 = vcmp.eq.s32.totalorder %v886_v51, %v5264_v41 }
 0x2b6   : > { %4218 = vmatpush3.bf16.msra.mxu1 %v4670_v29  ;;  %v6105_v49 = vsel %vm5626_vm7, 4294967295, %v6104_v49  ;;  %vm999_vm13 = vmor %vm923_vm3, %vm966_vm15  ;;  %vm926_vm15 = vcmp.eq.s32.totalorder %v886_v51, %v5256_v38  ;;  %vm1044_vm7 = vcmp.eq.s32.totalorder %v885_v0, %v5264_v41  ;;  %v4709_v29 = vld [vmem:[%s5216_s12 + $0x420] sm:$0xff]  }
 0x2b7   : > { %4219 = vmatprep.subr.bf16.mxu1 %v4672_v30  ;;  %4198 = vmatpush3.bf16.msra.mxu0 %v4673_v31  ;;  %vm1075_vm14 = vmor %vm999_vm13, %vm1042_vm8  ;;  %vm1121_vm8 = vcmp.eq.s32.totalorder %v886_v51, %v5269_v6  ;;  %v4711_v31 = vld [vmem:[%s5216_s12 + $0x458] sm:$0xff]   ;;  %v4720_v51 = vld [vmem:[%s5216_s12 + $0x4c8] sm:$0xff]  }
 0x2b8   : > { %4199 = vmatprep.subr.bf16.mxu0 %v4675_v33  ;;  %vm5639_vm5 = vmor %vm1075_vm14, %vm1118_vm10  ;;  %vm971_vm10 = vcmp.eq.s32.totalorder %v888_v57, %v5259_v40  ;;  %v891_v33 = vadd.s32 3840, %v5253_v36  ;;  %v4719_v36 = vld [vmem:[%s5216_s12 + $0x448] sm:$0xff]   ;;  %v4803_v30 = vld [vmem:[%s5216_s12 + $0x760] sm:$0xff]  }
 0x2b9   : > { %v6107_v55 = vsel %vm5639_vm5, 4294967295, %v6106_v55  ;;  %vm1002_vm3 = vmor %vm926_vm15, %vm969_vm9  ;;  %vm1047_vm5 = vcmp.eq.s32.totalorder %v888_v57, %v5264_v41  ;;  %vm928_vm9 = vcmp.eq.s32.totalorder %v888_v57, %v5256_v38  ;;  %vm1046_vm15 = vcmp.eq.s32.totalorder %v887_v9, %v5264_v41 }
 0x2ba   : > { %4220 = vmatpush3.bf16.msra.mxu1 %v4674_v35  ;;  %vm1078_vm13 = vmor %vm1002_vm3, %vm1045_vm11  ;;  %vm1123_vm11 = vcmp.eq.s32.totalorder %v888_v57, %v5269_v6  ;;  %v4712_v35 = vld [vmem:[%s5216_s12 + $0x4d8] sm:$0xff]   ;;  %v4726_v57 = vld [vmem:[%s5216_s12 + $0x480] sm:$0xff]  }
 0x2bb   : > { %4221 = vmatprep.subr.bf16.mxu1 %v4676_v37  ;;  %4200 = vmatpush3.bf16.msra.mxu0 %v4677_v39  ;;  %vm5652_vm14 = vmor %vm1078_vm13, %vm1121_vm8  ;;  %vm968_vm13 = vcmp.eq.s32.totalorder %v885_v0, %v5259_v40  ;;  %v4713_v37 = vld [vmem:[%s5216_s12 + $0x418] sm:$0xff]  }
 0x2bc   : > { %4201 = vmatprep.subr.bf16.mxu0 %v4679_v44  ;;  %v6109_v62 = vsel %vm5652_vm14, 4294967295, %v6108_v62  ;;  %vm1004_vm8 = vmor %vm928_vm9, %vm971_vm10  ;;  %vm925_vm10 = vcmp.eq.s32.totalorder %v885_v0, %v5256_v38  ;;  %vm1120_vm9 = vcmp.eq.s32.totalorder %v885_v0, %v5269_v6  ;;  %v4715_v44 = vld [vmem:[%s5216_s12 + $0x450] sm:$0xff]  }
 0x2bd   : > { %vm1080_vm3 = vmor %vm1004_vm8, %vm1047_vm5  ;;  %v4732_v0 = vld [vmem:[%s5216_s12 + $0x5f0] sm:$0xff]  }
 0x2be   : > { %4222 = vmatpush3.bf16.msra.mxu1 %v4678_v46  ;;  %vm5668_vm14 = vmor %vm1080_vm3, %vm1123_vm11  ;;  %vm970_vm3 = vcmp.eq.s32.totalorder %v887_v9, %v5259_v40  ;;  %v4714_v46 = vld [vmem:[%s5216_s12 + $0x498] sm:$0xff]  }
 0x2bf   : > { %4223 = vmatprep.subr.bf16.mxu1 %v4680_v47  ;;  %4202 = vmatpush3.bf16.msra.mxu0 %v4681_v48  ;;  %v6111_v5 = vsel %vm5668_vm14, 4294967295, %v6110_v5  ;;  %vm1001_vm11 = vmor %vm925_vm10, %vm968_vm13  ;;  %vm6114_vm13 = vnez %v6090_v8  ;;  %vm927_vm10 = vcmp.eq.s32.totalorder %v887_v9, %v5256_v38  ;;  %v4702_v8 = vld [vmem:[%s5216_s12 + $0x4b0] sm:$0xff]  }
 0x2c0   : > { %4203 = vmatprep.subr.bf16.mxu0 %v4683_v50  ;;  %vm1077_vm8 = vmor %vm1001_vm11, %vm1044_vm7  ;;  %vm1122_vm11 = vcmp.eq.s32.totalorder %v887_v9, %v5269_v6  ;;  %vm973_vm7 = vcmp.eq.s32.totalorder %v890_v16, %v5259_v40  ;;  %v4716_v47 = vld [vmem:[%s5216_s12 + $0x4d0] sm:$0xff]   ;;  %v4741_v9 = vld [vmem:[%s5216_s12 + $0x520] sm:$0xff]  }
 0x2c1   : > { %vm5684_vm5 = vmor %vm1077_vm8, %vm1120_vm9  ;;  %v4717_v48 = vld [vmem:[%s5216_s12 + $0x410] sm:$0xff]  }
 0x2c2   : > { %4224 = vmatpush3.bf16.msra.mxu1 %v4682_v52  ;;  %v6113_v13 = vsel %vm5684_vm5, 4294967295, %v6112_v13  ;;  %vm1003_vm9 = vmor %vm927_vm10, %vm970_vm3  ;;  %vm1049_vm3 = vcmp.eq.s32.totalorder %v890_v16, %v5264_v41  ;;  %vm1125_vm10 = vcmp.eq.s32.totalorder %v890_v16, %v5269_v6  ;;  %v4721_v52 = vld [vmem:[%s5216_s12 + $0x408] sm:$0xff]  }
 0x2c3   : > { %4225 = vmatprep.subr.bf16.mxu1 %v4684_v53  ;;  %4204 = vmatpush3.bf16.msra.mxu0 %v4685_v54  ;;  %vm6115_vm8 = vmpackc.low %vm5489_vm4, %vm5489_vm4  ;;  %v4724_v53 = vld [vmem:[%s5216_s12 + $0x4c0] sm:$0xff]  }
 0x2c4   : > { %4205 = vmatprep.subr.bf16.mxu0 %v4687_v56  ;;  %vm1079_vm5 = vmor %vm1003_vm9, %vm1046_vm15  ;;  %vm975_vm9 = vcmp.eq.s32.totalorder %v892_v22, %v5259_v40  ;;  %v4725_v54 = vld [vmem:[%s5216_s12 + $0x400] sm:$0xff]   ;;  %v4727_v56 = vld [vmem:[%s5216_s12 + $0x578] sm:$0xff]  }
 0x2c5   : > { %vm5706_vm14 = vmor %vm1079_vm5, %vm1122_vm11  ;;  %vm930_vm5 = vcmp.eq.s32.totalorder %v890_v16, %v5256_v38  ;;  %v4747_v16 = vld [vmem:[%s5216_s12 + $0x550] sm:$0xff]  }
 0x2c6   : > { %4226 = vmatpush3.bf16.msra.mxu1 %v4686_v58  ;;  %vm6118_vm4 = vmpackc.low %vm6114_vm13, %vm6114_vm13  ;;  %v4728_v58 = vld [vmem:[%s5216_s12 + $0x5f8] sm:$0xff]  }
 0x2c7   : > { %4227 = vmatprep.subr.bf16.mxu1 %v4688_v60  ;;  %4206 = vmatpush3.bf16.msra.mxu0 %v4689_v61  ;;  %vm4025_vm15 = vmpackc.low %vm5531_vm0, %vm5531_vm0  ;;  %v4729_v60 = vld [vmem:[%s5216_s12 + $0x538] sm:$0xff]   ;;  %v4731_v61 = vld [vmem:[%s5216_s12 + $0x570] sm:$0xff]  }
 0x2c8   : > { %4207 = vmatprep.subr.bf16.mxu0 %v4691_v63  ;;  %vm6119_vm13 = vmpackc.low %vm5502_vm12, %vm5502_vm12  ;;  %vm1051_vm12 = vcmp.eq.s32.totalorder %v892_v22, %v5264_v41  ;;  %v4730_v63 = vld [vmem:[%s5216_s12 + $0x5b8] sm:$0xff]  }
 0x2c9   : > { %vm1006_vm0 = vmor %vm930_vm5, %vm973_vm7  ;;  %vm932_vm7 = vcmp.eq.s32.totalorder %v892_v22, %v5256_v38  ;;  %vm972_vm5 = vcmp.eq.s32.totalorder %v889_v25, %v5259_v40 }
 0x2ca   : > { %4228 = vmatpush3.bf16.msra.mxu1 %v4690_v2  ;;  %vm1082_vm11 = vmor %vm1006_vm0, %vm1049_vm3  ;;  %vm1127_vm3 = vcmp.eq.s32.totalorder %v892_v22, %v5269_v6  ;;  %vm929_vm0 = vcmp.eq.s32.totalorder %v889_v25, %v5256_v38  ;;  %v4733_v2 = vld [vmem:[%s5216_s12 + $0x530] sm:$0xff]  }
 0x2cb   : > { %4229 = vmatprep.subr.bf16.mxu1 %v4692_v3  ;;  %4208 = vmatpush3.bf16.msra.mxu0 %v4693_v4  ;;  %v4737_v3 = vld [vmem:[%s5216_s12 + $0x528] sm:$0xff]   ;;  %v4739_v4 = vld [vmem:[%s5216_s12 + $0x560] sm:$0xff]   ;;  %v4750_v22 = vld [vmem:[%s5216_s12 + $0x590] sm:$0xff]  }
 0x2cc   : > { %4237 = vmatprep.subr.bf16.mxu0 %v4695_v7  ;;  %v4740_v7 = vld [vmem:[%s5216_s12 + $0x5e0] sm:$0xff]  }
 0x2ce   : > { %4230 = vmatpush3.bf16.msra.mxu1 %v4694_v10  ;;  %4016 = vmatmul.mubr.msk.bf16.vlgmr.msra.gmra.mxu0 %vm6115_vm8, %v5024_v42  ;;  %vm5737_vm8 = vmor %vm1082_vm11, %vm1125_vm10  ;;  %vm1124_vm11 = vcmp.eq.s32.totalorder %v889_v25, %v5269_v6  ;;  %v4743_v10 = vld [vmem:[%s5216_s12 + $0x558] sm:$0xff]  }
 0x2cf   : > { %4259 = vmatprep.subr.bf16.mxu1 %v4696_v11  ;;  %4238 = vmatpush3.bf16.msra.mxu0 %v4697_v12  ;;  %v4742_v11 = vld [vmem:[%s5216_s12 + $0x5a0] sm:$0xff]   ;;  %v4744_v12 = vld [vmem:[%s5216_s12 + $0x5d8] sm:$0xff]  }
 0x2d0   : > { %4022 = vmatprep.mubr.msk.bf16.mxu0 %vm6118_vm4, %v5024_v42  ;;  %4239 = vmatprep.subr.bf16.mxu0 %v4699_v15  ;;  %vm1008_vm4 = vmor %vm932_vm7, %vm975_vm9  ;;  %vm974_vm7 = vcmp.eq.s32.totalorder %v891_v33, %v5259_v40  ;;  %v4745_v15 = vld [vmem:[%s5216_s12 + $0x518] sm:$0xff]  }
 0x2d1   : > { %4020 = vmatmul.mubr.msk.bf16.vlgmr.msra.gmra.mxu1 %vm6119_vm13, %v5024_v42  ;;  %vm1048_vm13 = vcmp.eq.s32.totalorder %v889_v25, %v5264_v41  ;;  %vm1005_vm9 = vmor %vm929_vm0, %vm972_vm5  ;;  %vm1126_vm5 = vcmp.eq.s32.totalorder %v891_v33, %v5269_v6  ;;  %v4756_v25 = vld [vmem:[%s5216_s12 + $0x5c0] sm:$0xff]  }
 0x2d2   : > { %4260 = vmatpush3.bf16.msra.mxu1 %v4698_v17  ;;  %4026 = vmatprep.mubr.msk.bf16.mxu1 %vm4025_vm15, %v5024_v42  ;;  %vm1084_vm15 = vmor %vm1008_vm4, %vm1051_vm12  ;;  %vm1050_vm4 = vcmp.eq.s32.totalorder %v891_v33, %v5264_v41  ;;  %v4746_v17 = vld [vmem:[%s5216_s12 + $0x598] sm:$0xff]  }
 0x2d3   : > { %4261 = vmatprep.subr.bf16.mxu1 %v4700_v18  ;;  %4240 = vmatpush3.bf16.msra.mxu0 %v4701_v19  ;;  %vm5750_vm10 = vmor %vm1084_vm15, %vm1127_vm3  ;;  %vm931_vm15 = vcmp.eq.s32.totalorder %v891_v33, %v5256_v38  ;;  %v4748_v18 = vld [vmem:[%s5216_s12 + $0x5d0] sm:$0xff]   ;;  %v4761_v33 = vld [vmem:[%s5216_s12 + $0x638] sm:$0xff]  }
 0x2d4   : > { %4241 = vmatprep.subr.bf16.mxu0 %v4703_v59  ;;  %vm1081_vm12 = vmor %vm1005_vm9, %vm1048_vm13  ;;  %v4749_v19 = vld [vmem:[%s5216_s12 + $0x510] sm:$0xff]   ;;  %v4751_v59 = vld [vmem:[%s5216_s12 + $0x548] sm:$0xff]  }
 0x2d5   : > { %vm5763_vm3 = vmor %vm1081_vm12, %vm1124_vm11  ;;  %vm976_vm11 = vcmp.eq.s32.totalorder %v893_v45, %v5259_v40  ;;  %vm1052_vm12 = vcmp.eq.s32.totalorder %v893_v45, %v5264_v41  ;;  %v4718_v40 = vld [vmem:[%s5216_s12 + $0x490] sm:$0xff]  }
 0x2d6   : > { %4262 = vmatpush3.bf16.msra.mxu1 %v4702_v8  ;;  %vm1007_vm13 = vmor %vm931_vm15, %vm974_vm7  ;;  %vm933_vm7 = vcmp.eq.s32.totalorder %v893_v45, %v5256_v38  ;;  %v4723_v38 = vld [vmem:[%s5216_s12 + $0x440] sm:$0xff]   ;;  %v4752_v8 = vld [vmem:[%s5216_s12 + $0x5c8] sm:$0xff]  }
 0x2d7   : > { %4263 = vmatprep.subr.bf16.mxu1 %v4704_v14  ;;  %4242 = vmatpush3.bf16.msra.mxu0 %v4705_v23  ;;  %vm1083_vm0 = vmor %vm1007_vm13, %vm1050_vm4  ;;  %vm1128_vm4 = vcmp.eq.s32.totalorder %v893_v45, %v5269_v6  ;;  %v4722_v6 = vld [vmem:[%s5216_s12 + $0x488] sm:$0xff]   ;;  %v4755_v23 = vld [vmem:[%s5216_s12 + $0x540] sm:$0xff]  }
 0x2d8   : > { %4243 = vmatprep.subr.bf16.mxu0 %v4707_v24  ;;  %vm5776_vm9 = vmor %vm1083_vm0, %vm1126_vm5  ;;  %vm6130_vm0 = vnez %v6094_v20  ;;  %v4735_v20 = vld [vmem:[%s5216_s12 + $0x568] sm:$0xff]  }
 0x2d9   : > { %vm1009_vm15 = vmor %vm933_vm7, %vm976_vm11  ;;  %v4753_v14 = vld [vmem:[%s5216_s12 + $0x508] sm:$0xff]  }
 0x2da   : > { %4264 = vmatpush3.bf16.msra.mxu1 %v4706_v27  ;;  %vm1085_vm5 = vmor %vm1009_vm15, %vm1052_vm12  ;;  %v4754_v24 = vld [vmem:[%s5216_s12 + $0x588] sm:$0xff]   ;;  %v4757_v27 = vld [vmem:[%s5216_s12 + $0x500] sm:$0xff]  }
 0x2db   : > { %4265 = vmatprep.subr.bf16.mxu1 %v4708_v28  ;;  %4244 = vmatpush3.bf16.msra.mxu0 %v4709_v29  ;;  %vm5787_vm13 = vmor %vm1085_vm5, %vm1128_vm4  ;;  %v4759_v28 = vld [vmem:[%s5216_s12 + $0x678] sm:$0xff]   ;;  %v4758_v29 = vld [vmem:[%s5216_s12 + $0x580] sm:$0xff]   ;;  %vm6132_vm4 = vnez %v6109_v62  ;;  %vm6133_vm5 = vnez %v6107_v55 }
 0x2dc   : > { %4245 = vmatprep.subr.bf16.mxu0 %v4711_v31  ;;  %vm4023_vm11 = vmpackc.low %vm6130_vm0, %vm6130_vm0  ;;  %v4760_v31 = vld [vmem:[%s5216_s12 + $0x6f8] sm:$0xff]   ;;  %v4766_v55 = vld [vmem:[%s5216_s12 + $0x6b0] sm:$0xff]  }
 0x2dd   : > { %vm4029_vm12 = vmpackc.low %vm5600_vm6, %vm5600_vm6  ;;  %v4768_v62 = vld [vmem:[%s5216_s12 + $0x6e8] sm:$0xff]  }
 0x2de   : > { %4266 = vmatpush3.bf16.msra.mxu1 %v4710_v34  ;;  %vm4027_vm7 = vmpackc.low %vm5569_vm1, %vm5569_vm1  ;;  %v4763_v34 = vld [vmem:[%s5216_s12 + $0x670] sm:$0xff]   ;;  %vm6131_vm1 = vnez %v6105_v49  ;;  %v4767_v49 = vld [vmem:[%s5216_s12 + $0x668] sm:$0xff]  }
 0x2df   : > { %4267 = vmatprep.subr.bf16.mxu1 %v4712_v35  ;;  %4246 = vmatpush3.bf16.msra.mxu0 %v4713_v37  ;;  %vm4033_vm6 = vmpackc.low %vm5613_vm2, %vm5613_vm2  ;;  %v4762_v35 = vld [vmem:[%s5216_s12 + $0x6b8] sm:$0xff]   ;;  %v4764_v37 = vld [vmem:[%s5216_s12 + $0x6f0] sm:$0xff]  }
 0x2e0   : > { %4247 = vmatprep.subr.bf16.mxu0 %v4715_v44  ;;  %vm4031_vm2 = vmpackc.low %vm6131_vm1, %vm6131_vm1  ;;  %v4765_v44 = vld [vmem:[%s5216_s12 + $0x630] sm:$0xff]   ;;  %v4769_v45 = vld [vmem:[%s5216_s12 + $0x628] sm:$0xff]  }
 0x2e1   : > { %vm4037_vm15 = vmpackc.low %vm6132_vm4, %vm6132_vm4  ;;  %vm5026_vm4 = vmmov 0  }
 0x2e2   : > { %4268 = vmatpush3.bf16.msra.mxu1 %v4714_v46  ;;  %vm4035_vm0 = vmpackc.low %vm6133_vm5, %vm6133_vm5  ;;  %v4771_v46 = vld [vmem:[%s5216_s12 + $0x660] sm:$0xff]  }
 0x2e3   : > { %4269 = vmatprep.subr.bf16.mxu1 %v4716_v47  ;;  %4248 = vmatpush3.bf16.msra.mxu0 %v4717_v48  ;;  %v4772_v47 = vld [vmem:[%s5216_s12 + $0x6e0] sm:$0xff]   ;;  %vm4045_vm1 = vmpackc.low %vm5737_vm8, %vm5737_vm8 }
 0x2e4   : > { %4249 = vmatprep.subr.bf16.mxu0 %v4719_v36  ;;  %v4773_v48 = vld [vmem:[%s5216_s12 + $0x620] sm:$0xff]   ;;  %v4775_v36 = vld [vmem:[%s5216_s12 + $0x658] sm:$0xff]   ;;  %vm4049_vm8 = vmpackc.low %vm5750_vm10, %vm5750_vm10 }
 0x2e5   : > { %vm4047_vm10 = vmpackc.low %vm5763_vm3, %vm5763_vm3  ;;  %vm2824_vm3 = vcmask 588800  }
 0x2e6   : > { %4270 = vmatpush3.bf16.msra.mxu1 %v4718_v40  ;;  %v4774_v40 = vld [vmem:[%s5216_s12 + $0x6a0] sm:$0xff]  }
 0x2e7   : > { %4271 = vmatprep.subr.bf16.mxu1 %v4720_v51  ;;  %4250 = vmatpush3.bf16.msra.mxu0 %v4721_v52  ;;  %v4776_v51 = vld [vmem:[%s5216_s12 + $0x6d8] sm:$0xff]  }
 0x2e8   : > { %4251 = vmatprep.subr.bf16.mxu0 %v4723_v38  ;;  %v4777_v52 = vld [vmem:[%s5216_s12 + $0x618] sm:$0xff]   ;;  %v4779_v38 = vld [vmem:[%s5216_s12 + $0x650] sm:$0xff]  }
 0x2ea   : > { %4272 = vmatpush3.bf16.msra.mxu1 %v4722_v6  ;;  %v4778_v6 = vld [vmem:[%s5216_s12 + $0x698] sm:$0xff]  }
 0x2eb   : > { %4273 = vmatprep.subr.bf16.mxu1 %v4724_v53  ;;  %4252 = vmatpush3.bf16.msra.mxu0 %v4725_v54  ;;  %v4780_v53 = vld [vmem:[%s5216_s12 + $0x6d0] sm:$0xff]  }
 0x2ec   : > { %4281 = vmatprep.subr.bf16.mxu0 %v4727_v56  ;;  %v4781_v54 = vld [vmem:[%s5216_s12 + $0x610] sm:$0xff]   ;;  %v4783_v56 = vld [vmem:[%s5216_s12 + $0x648] sm:$0xff]  }
 0x2ee   : > { %4274 = vmatpush3.bf16.msra.mxu1 %v4726_v57  ;;  %4024 = vmatmul.mubr.msk.bf16.vlgmr.msra.gmra.mxu0 %vm4023_vm11, %v5024_v42  ;;  %vm6134_vm11 = vnez %v6111_v5  ;;  %v4770_v5 = vld [vmem:[%s5216_s12 + $0x6a8] sm:$0xff]   ;;  %v4782_v57 = vld [vmem:[%s5216_s12 + $0x690] sm:$0xff]  }
 0x2ef   : > { %4303 = vmatprep.subr.bf16.mxu1 %v4728_v58  ;;  %4282 = vmatpush3.bf16.msra.mxu0 %v4729_v60  ;;  %v4784_v58 = vld [vmem:[%s5216_s12 + $0x6c8] sm:$0xff]  }
 0x2f0   : > { %4030 = vmatprep.mubr.msk.bf16.mxu0 %vm4029_vm12, %v5024_v42  ;;  %4283 = vmatprep.subr.bf16.mxu0 %v4731_v61  ;;  %vm4041_vm12 = vmpackc.low %vm6134_vm11, %vm6134_vm11  ;;  %v4785_v60 = vld [vmem:[%s5216_s12 + $0x608] sm:$0xff]   ;;  %v4787_v61 = vld [vmem:[%s5216_s12 + $0x640] sm:$0xff]  }
 0x2f1   : > { %4028 = vmatmul.mubr.msk.bf16.vlgmr.msra.gmra.mxu1 %vm4027_vm7, %v5024_v42  ;;  %vm6135_vm7 = vnez %v6113_v13 }
 0x2f2   : > { %4304 = vmatpush3.bf16.msra.mxu1 %v4730_v63  ;;  %4034 = vmatprep.mubr.msk.bf16.mxu1 %vm4033_vm6, %v5024_v42  ;;  %v4786_v63 = vld [vmem:[%s5216_s12 + $0x688] sm:$0xff]   ;;  %vm4039_vm6 = vmpackc.low %vm6135_vm7, %vm6135_vm7 }
 0x2f3   : > { %4305 = vmatprep.subr.bf16.mxu1 %v4732_v0  ;;  %4284 = vmatpush3.bf16.msra.mxu0 %v4733_v2  ;;  %v4788_v0 = vld [vmem:[%s5216_s12 + $0x6c0] sm:$0xff]  }
 0x2f4   : > { %4285 = vmatprep.subr.bf16.mxu0 %v4735_v20  ;;  %v4789_v2 = vld [vmem:[%s5216_s12 + $0x600] sm:$0xff]   ;;  %v4791_v20 = vld [vmem:[%s5216_s12 + $0x778] sm:$0xff]  }
 0x2f6   : > { %4306 = vmatpush3.bf16.msra.mxu1 %v4734_v26  ;;  %v4790_v26 = vld [vmem:[%s5216_s12 + $0x680] sm:$0xff]  }
 0x2f7   : > { %4307 = vmatprep.subr.bf16.mxu1 %v4736_v32  ;;  %4286 = vmatpush3.bf16.msra.mxu0 %v4737_v3  ;;  %v4792_v32 = vld [vmem:[%s5216_s12 + $0x7f8] sm:$0xff]  }
 0x2f8   : > { %4287 = vmatprep.subr.bf16.mxu0 %v4739_v4  ;;  %v4793_v3 = vld [vmem:[%s5216_s12 + $0x738] sm:$0xff]   ;;  %v4795_v4 = vld [vmem:[%s5216_s12 + $0x770] sm:$0xff]  }
 0x2fa   : > { %4308 = vmatpush3.bf16.msra.mxu1 %v4738_v43 }
 0x2fb   : > { %4309 = vmatprep.subr.bf16.mxu1 %v4740_v7  ;;  %4288 = vmatpush3.bf16.msra.mxu0 %v4741_v9  ;;  %v4794_v7 = vld [vmem:[%s5216_s12 + $0x7b8] sm:$0xff]  }
 0x2fc   : > { %4289 = vmatprep.subr.bf16.mxu0 %v4743_v10  ;;  %v4796_v10 = vld [vmem:[%s5216_s12 + $0x7f0] sm:$0xff]  }
 0x2fe   : > { %4310 = vmatpush3.bf16.msra.mxu1 %v4742_v11  ;;  %v4797_v11 = vld [vmem:[%s5216_s12 + $0x730] sm:$0xff]  }
 0x2ff   : > { %4311 = vmatprep.subr.bf16.mxu1 %v4744_v12  ;;  %4290 = vmatpush3.bf16.msra.mxu0 %v4745_v15  ;;  %v4799_v12 = vld [vmem:[%s5216_s12 + $0x768] sm:$0xff]  }
 0x300   : > { %4291 = vmatprep.subr.bf16.mxu0 %v4747_v16 }
 0x302   : > { %4312 = vmatpush3.bf16.msra.mxu1 %v4746_v17 }
 0x303   : > { %4313 = vmatprep.subr.bf16.mxu1 %v4748_v18  ;;  %4292 = vmatpush3.bf16.msra.mxu0 %v4749_v19  ;;  %v4800_v18 = vld [vmem:[%s5216_s12 + $0x7e8] sm:$0xff]  }
 0x304   : > { %4293 = vmatprep.subr.bf16.mxu0 %v4751_v59  ;;  %v4801_v19 = vld [vmem:[%s5216_s12 + $0x728] sm:$0xff]  }
 0x306   : > { %4314 = vmatpush3.bf16.msra.mxu1 %v4750_v22 }
 0x307   : > { %4315 = vmatprep.subr.bf16.mxu1 %v4752_v8  ;;  %4294 = vmatpush3.bf16.msra.mxu0 %v4753_v14  ;;  %v4802_v14 = vld [vmem:[%s5216_s12 + $0x7a8] sm:$0xff]  }
 0x308   : > { %4295 = vmatprep.subr.bf16.mxu0 %v4755_v23 }
 0x30a   : > { %4316 = vmatpush3.bf16.msra.mxu1 %v4754_v24  ;;  %v4804_v24 = vld [vmem:[%s5216_s12 + $0x7e0] sm:$0xff]  }
 0x30b   : > { %4317 = vmatprep.subr.bf16.mxu1 %v4756_v25  ;;  %4296 = vmatpush3.bf16.msra.mxu0 %v4757_v27  ;;  %v4805_v25 = vld [vmem:[%s5216_s12 + $0x720] sm:$0xff]   ;;  %v4807_v27 = vld [vmem:[%s5216_s12 + $0x758] sm:$0xff]  }
 0x30c   : > { %4325 = vmatprep.subr.bf16.mxu0 %v4759_v28  ;;  %v4806_v28 = vld [vmem:[%s5216_s12 + $0x7a0] sm:$0xff]  }
 0x30e   : > { %4318 = vmatpush3.bf16.msra.mxu1 %v4758_v29  ;;  %4032 = vmatmul.mubr.msk.bf16.vlgmr.msra.gmra.mxu0 %vm4031_vm2, %v5024_v42  ;;  %vm4043_vm2 = vmpackc.low %vm5706_vm14, %vm5706_vm14  ;;  %v4808_v29 = vld [vmem:[%s5216_s12 + $0x7d8] sm:$0xff]   ;;  %vm2828_vm14 = vcmask 1043456  }
 0x30f   : > { %4347 = vmatprep.subr.bf16.mxu1 %v4760_v31  ;;  %4326 = vmatpush3.bf16.msra.mxu0 %v4761_v33  ;;  %v4809_v31 = vld [vmem:[%s5216_s12 + $0x718] sm:$0xff]   ;;  %v4811_v33 = vld [vmem:[%s5216_s12 + $0x750] sm:$0xff]  }
 0x310   : > { %4038 = vmatprep.mubr.msk.bf16.mxu0 %vm4037_vm15, %v5024_v42  ;;  %4327 = vmatprep.subr.bf16.mxu0 %v4763_v34  ;;  %v4810_v34 = vld [vmem:[%s5216_s12 + $0x798] sm:$0xff]   ;;  %vm4051_vm15 = vmpackc.low %vm5776_vm9, %vm5776_vm9 }
 0x311   : > { %4036 = vmatmul.mubr.msk.bf16.vlgmr.msra.gmra.mxu1 %vm4035_vm0, %v5024_v42 }
 0x312   : > { %4348 = vmatpush3.bf16.msra.mxu1 %v4762_v35  ;;  %4042 = vmatprep.mubr.msk.bf16.mxu1 %vm4041_vm12, %v5024_v42  ;;  %v4812_v35 = vld [vmem:[%s5216_s12 + $0x7d0] sm:$0xff]  }
 0x313   : > { %4349 = vmatprep.subr.bf16.mxu1 %v4764_v37  ;;  %4328 = vmatpush3.bf16.msra.mxu0 %v4765_v44  ;;  %v4813_v37 = vld [vmem:[%s5216_s12 + $0x710] sm:$0xff]   ;;  %v4815_v44 = vld [vmem:[%s5216_s12 + $0x748] sm:$0xff]  }
 0x314   : > { %4329 = vmatprep.subr.bf16.mxu0 %v4767_v49  ;;  %v4814_v49 = vld [vmem:[%s5216_s12 + $0x790] sm:$0xff]  }
 0x316   : > { %4350 = vmatpush3.bf16.msra.mxu1 %v4766_v55  ;;  %v4816_v55 = vld [vmem:[%s5216_s12 + $0x7c8] sm:$0xff]  }
 0x317   : > { %4351 = vmatprep.subr.bf16.mxu1 %v4768_v62  ;;  %4330 = vmatpush3.bf16.msra.mxu0 %v4769_v45  ;;  %v4817_v62 = vld [vmem:[%s5216_s12 + $0x708] sm:$0xff]   ;;  %v4819_v45 = vld [vmem:[%s5216_s12 + $0x740] sm:$0xff]  }
 0x318   : > { %4331 = vmatprep.subr.bf16.mxu0 %v4771_v46  ;;  %v4818_v46 = vld [vmem:[%s5216_s12 + $0x788] sm:$0xff]  }
 0x31a   : > { %4352 = vmatpush3.bf16.msra.mxu1 %v4770_v5  ;;  %v4820_v5 = vld [vmem:[%s5216_s12 + $0x7c0] sm:$0xff]  }
 0x31b   : > { %4353 = vmatprep.subr.bf16.mxu1 %v4772_v47  ;;  %4332 = vmatpush3.bf16.msra.mxu0 %v4773_v48  ;;  %v4821_v47 = vld [vmem:[%s5216_s12 + $0x700] sm:$0xff]  }
 0x31c   : > { %4333 = vmatprep.subr.bf16.mxu0 %v4775_v36  ;;  %v4823_v48 = vld [vmem:[%s5216_s12 + $0x820] ss:$0 sps:$4 sm:$0xff]  }
 0x31d   : > { %v4822_v36 = vld [vmem:[%s5216_s12 + $0x780] sm:$0xff]  }
 0x31e   : > { %4354 = vmatpush3.bf16.msra.mxu1 %v4774_v40  ;;  %v5025_v40 = vmov 0.0  }
 0x31f   : > { %4355 = vmatprep.subr.bf16.mxu1 %v4776_v51  ;;  %4334 = vmatpush3.bf16.msra.mxu0 %v4777_v52  ;;  %v2830_v51 = vsel %vm2828_vm14, %v4823_v48, 0 }
 0x320   : > { %4335 = vmatprep.subr.bf16.mxu0 %v4779_v38 }
 0x322   : > { %4356 = vmatpush3.bf16.msra.mxu1 %v4778_v6  ;;  %v4824_v6 = vld [vmem:[%s5216_s12 + $0x818] sm:$0xff]  }
 0x323   : > { %4357 = vmatprep.subr.bf16.mxu1 %v4780_v53  ;;  %4336 = vmatpush3.bf16.msra.mxu0 %v4781_v54 }
 0x324   : > { %4337 = vmatprep.subr.bf16.mxu0 %v4783_v56 }
 0x326   : > { %4358 = vmatpush3.bf16.msra.mxu1 %v4782_v57 }
 0x327   : > { %4359 = vmatprep.subr.bf16.mxu1 %v4784_v58  ;;  %4338 = vmatpush3.bf16.msra.mxu0 %v4785_v60  ;;  %v4825_v60 = vld [vmem:[%s5216_s12 + $0x810] sm:$0xff]  }
 0x328   : > { %4339 = vmatprep.subr.bf16.mxu0 %v4787_v61 }
 0x32a   : > { %4360 = vmatpush3.bf16.msra.mxu1 %v4786_v63 }
 0x32b   : > { %4361 = vmatprep.subr.bf16.mxu1 %v4788_v0  ;;  %4340 = vmatpush3.bf16.msra.mxu0 %v4789_v2  ;;  %v4826_v2 = vld [vmem:[%s5216_s12 + $0x808] sm:$0xff]  }
 0x32c   : > { %4369 = vmatprep.subr.bf16.mxu0 %v4791_v20  ;;  %v4827_v20 = vld [vmem:[%s5216_s12 + $0x800] sm:$0xff]  }
 0x32d   : > { %v4077_v43 = vpop.f32.mrf.mxu0 }
 0x32e   : > { %4362 = vmatpush3.bf16.msra.mxu1 %v4790_v26  ;;  %4040 = vmatmul.mubr.msk.bf16.vlgmr.msra.gmra.mxu0 %vm4039_vm6, %v5024_v42 }
 0x32f   : > { %4391 = vmatprep.subr.bf16.mxu1 %v4792_v32  ;;  %4370 = vmatpush3.bf16.msra.mxu0 %v4793_v3  ;;  %v4078_v9 = vpop.f32.mrf.mxu0 }
 0x330   : > { %4046 = vmatprep.mubr.msk.bf16.mxu0 %vm4045_vm1, %v5024_v42  ;;  %v4079_v13 = vadd.f32 %v4078_v9, %v4077_v43  ;;  %4371 = vmatprep.subr.bf16.mxu0 %v4795_v4 }
 0x331   : > { %4044 = vmatmul.mubr.msk.bf16.vlgmr.msra.gmra.mxu1 %vm4043_vm2, %v5024_v42  ;;  %v4099_v1 = vpop.f32.mrf.mxu1  ;;  %v4080_v15 = vpop.f32.mrf.mxu0 }
 0x332   : > { %4392 = vmatpush3.bf16.msra.mxu1 %v4794_v7  ;;  %4050 = vmatprep.mubr.msk.bf16.mxu1 %vm4049_vm8, %v5024_v42 }
 0x333   : > { %v4100_v16 = vpop.f32.mrf.mxu1  ;;  %4393 = vmatprep.subr.bf16.mxu1 %v4796_v10  ;;  %4372 = vmatpush3.bf16.msra.mxu0 %v4797_v11  ;;  %v4081_v17 = vpop.f32.mrf.mxu0 }
 0x334   : > { %v4101_v59 = vadd.f32 %v4100_v16, %v4099_v1  ;;  %4373 = vmatprep.subr.bf16.mxu0 %v4799_v12 }
 0x335   : > { %v4102_v22 = vpop.f32.mrf.mxu1 }
 0x336   : > { %v5920_v8 = vadd.f32 %v4101_v59, %v4079_v13  ;;  %4394 = vmatpush3.bf16.msra.mxu1 %v4798_v21 }
 0x337   : > { %v4103_v23 = vpop.f32.mrf.mxu1  ;;  %4395 = vmatprep.subr.bf16.mxu1 %v4800_v18  ;;  %4374 = vmatpush3.bf16.msra.mxu0 %v4801_v19 }
 0x338   : > { %4375 = vmatprep.subr.bf16.mxu0 %v4803_v30 }
 0x33a   : > { %4396 = vmatpush3.bf16.msra.mxu1 %v4802_v14 }
 0x33b   : > { %4397 = vmatprep.subr.bf16.mxu1 %v4804_v24  ;;  %4376 = vmatpush3.bf16.msra.mxu0 %v4805_v25 }
 0x33c   : > { %4377 = vmatprep.subr.bf16.mxu0 %v4807_v27 }
 0x33e   : > { %4398 = vmatpush3.bf16.msra.mxu1 %v4806_v28 }
 0x33f   : > { %4399 = vmatprep.subr.bf16.mxu1 %v4808_v29  ;;  %4378 = vmatpush3.bf16.msra.mxu0 %v4809_v31 }
 0x340   : > { %4379 = vmatprep.subr.bf16.mxu0 %v4811_v33 }
 0x342   : > { %4400 = vmatpush3.bf16.msra.mxu1 %v4810_v34 }
 0x343   : > { %4401 = vmatprep.subr.bf16.mxu1 %v4812_v35  ;;  %4380 = vmatpush3.bf16.msra.mxu0 %v4813_v37 }
 0x344   : > { %4381 = vmatprep.subr.bf16.mxu0 %v4815_v44 }
 0x346   : > { %4402 = vmatpush3.bf16.msra.mxu1 %v4814_v49 }
 0x347   : > { %4403 = vmatprep.subr.bf16.mxu1 %v4816_v55  ;;  %4382 = vmatpush3.bf16.msra.mxu0 %v4817_v62 }
 0x348   : > { %4383 = vmatprep.subr.bf16.mxu0 %v4819_v45 }
 0x34a   : > { %4404 = vmatpush3.bf16.msra.mxu1 %v4818_v46 }
 0x34b   : > { %4405 = vmatprep.subr.bf16.mxu1 %v4820_v5  ;;  %4384 = vmatpush3.bf16.msra.mxu0 %v4821_v47 }
 0x34c   : > { %4419 = vmatprep.subr.bf16.mxu0 %v5025_v40 }
 0x34d   : > { %v4121_v52 = vpop.f32.mrf.mxu0 }
 0x34e   : > { %4406 = vmatpush3.bf16.msra.mxu1 %v4822_v36  ;;  %4048 = vmatmul.mubr.msk.bf16.vlgmr.msra.gmra.mxu0 %vm4047_vm10, %v5024_v42 }
 0x34f   : > { %4420 = vmatpush3.bf16.msra.mxu0 %v2830_v51  ;;  %v4122_v38 = vpop.f32.mrf.mxu0  ;;  %4429 = vmatprep.mubr.msk.bf16.mxu0 %vm5026_vm4, %v5025_v40 }
 0x350   : > { %v4123_v53 = vadd.f32 %v4122_v38, %v4121_v52  ;;  %4421 = vmatprep.subr.bf16.mxu0 %v5025_v40 }
 0x351   : > { %v4143_v54 = vpop.f32.mrf.mxu1  ;;  %4052 = vmatmul.mubr.msk.bf16.vlgmr.msra.gmra.mxu1 %vm4051_vm15, %v5024_v42  ;;  %v4124_v39 = vpop.f32.mrf.mxu0  ;;  %v3727_v42 = vsel %vm5787_vm13, 1.0, %v5025_v40 }
 0x352   : > { %v2947_v56 = vadd.f32 %v4123_v53, %v5920_v8  ;;  %v1260_v26 = vpack.c.bf16 %v3727_v42, %v3727_v42 }
 0x353   : > { %v4144_v57 = vpop.f32.mrf.mxu1  ;;  %4422 = vmatpush3.bf16.msra.mxu0 %v4824_v6  ;;  %v4125_v58 = vpop.f32.mrf.mxu0 }
 0x354   : > { %v4145_v61 = vadd.f32 %v4144_v57, %v4143_v54  ;;  %4423 = vmatprep.subr.bf16.mxu0 %v5025_v40 }
 0x355   : > { %v4146_v63 = vpop.f32.mrf.mxu1 }
 0x356   : > { %v2987_v50 = vadd.f32 %v4145_v61, %v2947_v56 }
 0x357   : > { %v4147_v0 = vpop.f32.mrf.mxu1  ;;  %4424 = vmatpush3.bf16.msra.mxu0 %v4825_v60 }
 0x358   : > { %4425 = vmatprep.subr.bf16.mxu0 %v5025_v40 }
 0x35b   : > { %4426 = vmatpush3.bf16.msra.mxu0 %v4826_v2 }
 0x35c   : > { %4427 = vmatprep.subr.bf16.mxu0 %v5025_v40 }
 0x35f   : > { %4428 = vmatpush3.bf16.msra.mxu0 %v4827_v20 }
 0x362   : > { %4430 = vmatmul.mubr.msk.bf16.vlgmr.msra.gmra.mxu0 %vm2824_vm3, %v1260_v26 }
 0x36e   : > { %v4165_v32 = vpop.f32.mrf.mxu0 }
 0x370   : > { %v4166_v3 = vpop.f32.mrf.mxu0 }
 0x371   : > { %v4187_v4 = vpop.f32.mrf.mxu1  ;;  %v4167_v43 = vadd.f32 %v4166_v3, %v4165_v32 }
 0x372   : > { %v4168_v7 = vpop.f32.mrf.mxu0 }
 0x373   : > { %v3027_v9 = vadd.f32 %v4167_v43, %v2987_v50  ;;  %v4188_v10 = vpop.f32.mrf.mxu1 }
 0x374   : > { %v4189_v11 = vadd.f32 %v4188_v10, %v4187_v4  ;;  %v4169_v13 = vpop.f32.mrf.mxu0 }
 0x375   : > { %v4190_v12 = vpop.f32.mrf.mxu1 }
 0x376   : > { %v3067_v1 = vadd.f32 %v4189_v11, %v3027_v9 }
 0x377   : > { %v4191_v15 = vpop.f32.mrf.mxu1 }
 0x38e   : > { %v4209_v21 = vpop.f32.mrf.mxu0 }
 0x390   : > { %v4210_v16 = vpop.f32.mrf.mxu0 }
 0x391   : > { %v4231_v41 = vpop.f32.mrf.mxu1  ;;  %v4211_v17 = vadd.f32 %v4210_v16, %v4209_v21 }
 0x392   : > { %v4212_v18 = vpop.f32.mrf.mxu0 }
 0x393   : > { %v3107_v19 = vadd.f32 %v4211_v17, %v3067_v1  ;;  %v4232_v59 = vpop.f32.mrf.mxu1 }
 0x394   : > { %v4233_v30 = vadd.f32 %v4232_v59, %v4231_v41  ;;  %v4213_v22 = vpop.f32.mrf.mxu0 }
 0x395   : > { %v4234_v8 = vpop.f32.mrf.mxu1 }
 0x396   : > { %v3147_v14 = vadd.f32 %v4233_v30, %v3107_v19 }
 0x397   : > { %v4235_v23 = vpop.f32.mrf.mxu1 }
 0x3ae   : > { %v4253_v24 = vpop.f32.mrf.mxu0 }
 0x3b0   : > { %v4254_v25 = vpop.f32.mrf.mxu0 }
 0x3b1   : > { %v4275_v27 = vpop.f32.mrf.mxu1  ;;  %v4255_v28 = vadd.f32 %v4254_v25, %v4253_v24 }
 0x3b2   : > { %v4256_v29 = vpop.f32.mrf.mxu0 }
 0x3b3   : > { %v3187_v31 = vadd.f32 %v4255_v28, %v3147_v14  ;;  %v4276_v33 = vpop.f32.mrf.mxu1 }
 0x3b4   : > { %v4277_v34 = vadd.f32 %v4276_v33, %v4275_v27  ;;  %v4257_v35 = vpop.f32.mrf.mxu0 }
 0x3b5   : > { %v4278_v37 = vpop.f32.mrf.mxu1 }
 0x3b6   : > { %v3227_v44 = vadd.f32 %v4277_v34, %v3187_v31 }
 0x3b7   : > { %v4279_v49 = vpop.f32.mrf.mxu1 }
 0x3ce   : > { %v4297_v55 = vpop.f32.mrf.mxu0 }
 0x3d0   : > { %v4298_v62 = vpop.f32.mrf.mxu0 }
 0x3d1   : > { %v4319_v45 = vpop.f32.mrf.mxu1  ;;  %v4299_v46 = vadd.f32 %v4298_v62, %v4297_v55 }
 0x3d2   : > { %v4300_v5 = vpop.f32.mrf.mxu0 }
 0x3d3   : > { %v3267_v47 = vadd.f32 %v4299_v46, %v3227_v44  ;;  %v4320_v48 = vpop.f32.mrf.mxu1 }
 0x3d4   : > { %v4321_v36 = vadd.f32 %v4320_v48, %v4319_v45  ;;  %v4301_v40 = vpop.f32.mrf.mxu0 }
 0x3d5   : > { %v4322_v51 = vpop.f32.mrf.mxu1 }
 0x3d6   : > { %v3307_v52 = vadd.f32 %v4321_v36, %v3267_v47 }
 0x3d7   : > { %v4323_v38 = vpop.f32.mrf.mxu1 }
 0x3ee   : > { %v4341_v6 = vpop.f32.mrf.mxu0 }
 0x3f0   : > { %v4342_v53 = vpop.f32.mrf.mxu0 }
 0x3f1   : > { %v4363_v54 = vpop.f32.mrf.mxu1  ;;  %v4343_v2 = vadd.f32 %v4342_v53, %v4341_v6 }
 0x3f2   : > { %v4344_v39 = vpop.f32.mrf.mxu0 }
 0x3f3   : > { %v4364_v56 = vpop.f32.mrf.mxu1  ;;  %v3347_v32 = vadd.f32 %v4343_v2, %v3307_v52 }
 0x3f4   : > { %v4345_v57 = vpop.f32.mrf.mxu0  ;;  %v4365_v4 = vadd.f32 %v4364_v56, %v4363_v54 }
 0x3f5   : > { %v4366_v58 = vpop.f32.mrf.mxu1 }
 0x3f6   : > { %v3387_v7 = vadd.f32 %v4365_v4, %v3347_v32 }
 0x3f7   : > { %v4367_v60 = vpop.f32.mrf.mxu1 }
 0x40e   : > { %v4385_v61 = vpop.f32.mrf.mxu0 }
 0x410   : > { %v4386_v63 = vpop.f32.mrf.mxu0 }
 0x411   : > { %v4407_v50 = vpop.f32.mrf.mxu1  ;;  %v4387_v43 = vadd.f32 %v4386_v63, %v4385_v61 }
 0x412   : > { %v4388_v0 = vpop.f32.mrf.mxu0 }
 0x413   : > { %v4408_v20 = vpop.f32.mrf.mxu1  ;;  %v3427_v9 = vadd.f32 %v4387_v43, %v3387_v7 }
 0x414   : > { %v4389_v42 = vpop.f32.mrf.mxu0  ;;  %v4409_v10 = vadd.f32 %v4408_v20, %v4407_v50 }
 0x415   : > { %v4410_v26 = vpop.f32.mrf.mxu1 }
 0x416   : > { %v3467_v11 = vadd.f32 %v4409_v10, %v3427_v9 }
 0x417   : > { %v4411_v3 = vpop.f32.mrf.mxu1 }
 0x422   : > { %v3506_v13 = vpop.f32.mrf.mxu0 }
 0x423   : > { %v3507_v12 = vadd.f32 %v3506_v13, %v3467_v11 }
 0x424   : > { %v4431_v1 = vpop.f32.mrf.mxu0  ;;  %3515 = sbr.rel (%p4054_p3) target bundleno = 1068 (0x42c), region = 48 }
 0x426   : > { %v3509_v15 = vpop.f32.mrf.mxu0 }
 0x428   : > { %v4432_v21 = vpop.f32.mrf.mxu0 }
 0x429   : > { %3516 = vst [vmem:[%s5959_s25] sm:$0xff] %v3507_v12  ;;  %3517 = vst [vmem:[%s5959_s25 + $0x8] sm:$0xff] %v3507_v12  ;;  %v3518_v16 = vmul.f32 %v3507_v12, %v3507_v12 }
 0x42b   : > { %3519 = vst [vmem:[%s5959_s25 + $0x10] sm:$0xff] %v3518_v16 }
 0x42c PF: > { %p4055_p11 = scmp.le.s32.totalorder %s4996_s21, 0 }
 0x42e   : > { %3523 = sbr.rel (%p4055_p11) target bundleno = 1080 (0x438), region = 52 }
 0x433   : > { %v3524_v41 = vld [vmem:[%s5959_s25] sm:$0xff]  ;;  %v3527_v17 = vld [vmem:[%s5959_s25 + $0x8] sm:$0xff]  ;;  %v3530_v18 = vld [vmem:[%s5959_s25 + $0x10] sm:$0xff]  ;;  %v3531_v19 = vmul.f32 %v3507_v12, %v3507_v12 }
 0x434   : > { %v3525_v59 = vmax.f32 %v3524_v41, %v3507_v12  ;;  %v3528_v30 = vadd.f32 %v3527_v17, %v3507_v12 }
 0x435   : > { %v3532_v22 = vadd.f32 %v3531_v19, %v3530_v18 }
 0x436   : > { %3526 = vst [vmem:[%s5959_s25] sm:$0xff] %v3525_v59  ;;  %3529 = vst [vmem:[%s5959_s25 + $0x8] sm:$0xff] %v3528_v30 }
 0x437   : > { %3533 = vst [vmem:[%s5959_s25 + $0x10] sm:$0xff] %v3532_v22 }
 0x438 PF: > { %p4056_p13 = scmp.ne.s32.totalorder %s4996_s21, 1 }
 0x43a   : > { %3537 = sbr.rel (%p4056_p13) target bundleno = 1115 (0x45b), region = 56 }
 0x43f   : > { %v3538_v8 = vld [vmem:[%s5959_s25 + $0x8] sm:$0xff]  ;;  %v3540_v14 = vld [vmem:[%s5959_s25 + $0x10] sm:$0xff] }
 0x440   : > { %v3539_v23 = vmul.f32 0.5, %v3538_v8  ;;  %v3541_v24 = vmul.f32 0.5, %v3540_v14 }
 0x442   : > { %v3542_v25 = vmul.f32 %v3539_v23, %v3539_v23  ;;  %3544 = vst [vmem:[%s5959_s25 + $0x8] sm:$0xff] %v3539_v23 }
 0x444   : > { %v3543_v27 = vsub.f32 %v3541_v24, %v3542_v25 }
 0x446   : > { %v3545_v28 = vmax.f32 %v3543_v27, 0.0 }
 0x448   : > { %4832 = vrsqrt.f32 %v3545_v28  ;;  %vm3548_vm9 = vcmp.eq.f32.partialorder %v3545_v28, inf  ;;  %v3551_v31 = vand.u32 2147483648, %v3545_v28  ;;  %vm3550_vm13 = vcmp.eq.f32.partialorder %v3545_v28, 0.0 }
 0x455   : > { %v4833_v29 = vpop.eup %4832 }
 0x456   : > { %v3547_v33 = vmul.f32 %v4833_v29, %v3545_v28 }
 0x458   : > { %v3549_v34 = vsel %vm3548_vm9, %v3545_v28, %v3547_v33 }
 0x459   : > { %v3552_v35 = vsel %vm3550_vm13, %v3551_v31, %v3549_v34 }
 0x45a   : > { %3553 = vst [vmem:[%s5959_s25 + $0x10] sm:$0xff] %v3552_v35 }
 0x45b PF: > { %s4438_s21 = smul.u32 384, %s5000_s22  ;;  %s3569_s7 = sshll.u32 %s5959_s25, 4  ;;  %s3570_s7 = int_to_ptr.vmem [resolvable:$true] %s3569_s7 }
 0x45c   : > { %s3555_s26 = scalar_lea.sflag [#allocation4], %s260_s3  ;;  %s4888_s13 = scalar_lea.vmem %s3570_s7, 384 }
 0x45d   : > { %s3567_s28 = scalar_lea.hbm %s6037_s4, %s4438_s21  ;;  %p4889_p5 = scmp.ne.s32.totalorder %s3570_s7, %s4888_s13 }
 0x45e   : > { %p6136_p6 = scmp.ne.s32.totalorder %s6051_s5, 0  ;;  %s5027_s8 = smov [#allocation7]  }
 0x45f   : > { %s4892_s27 = sshll.u32 %s5027_s8, 4  ;;  %s4893_s27 = int_to_ptr.vmem [resolvable:$false] %s4892_s27 }
 0x460   : > { %p4890_p8 = pnand %p4889_p5, %p6136_p6  ;;  %s4894_s11 = scalar_lea.vmem %s4893_s27, 768 }
 0x461   : > { %p4895_p9 = scmp.lt.s32.totalorder %s3570_s7, %s4893_s27  ;;  %p4896_p10 = scmp.lt.s32.totalorder %s4894_s11, %s4888_s13 }
 0x462   : > { %p4891_p7 = pneg %p4890_p8 }
 0x463   : > { %p4897_p12 = por %p4896_p10, %p4895_p9 }
 0x465   : > { %p4898_p0 = pnand %p4897_p12, %p4891_p7 }
 0x467   : > { %4901 = shalt.err (!%p4898_p0)
}
 0x468   : > { %s4902_s22 = scalar_lea.hbm %s3567_s28, 384  ;;  %s4906_s6 = scalar_lea.hbm %s6037_s4, 768 }
 0x469   : > { %p4903_p4 = scmp.ne.s32.totalorder %s3567_s28, %s4902_s22  ;;  %p4907_p3 = scmp.lt.s32.totalorder %s3567_s28, %s6037_s4 }
 0x46a   : > { %p4908_p11 = scmp.lt.s32.totalorder %s4906_s6, %s4902_s22 }
 0x46b   : > { %p4904_p2 = pnand %p4903_p4, %p6136_p6 }
 0x46c   : > { %p4909_p13 = por %p4908_p11, %p4907_p3 }
 0x46d   : > { %p4905_p1 = pneg %p4904_p2 }
 0x46f   : > { %p4910_p5 = pnand %p4909_p13, %p4905_p1 }
 0x471   : > { %4913 = shalt.err (!%p4910_p5)
}
 0x472   : > { %4445 = dma.vmem_to_hbm [thread:$0]  (%p6136_p6), %s3570_s7, 384, %s3567_s28, %s3555_s26  }
 0x473 PF: > { %s6137_s15 = sld [smem:[#allocation12_spill]] }
 0x474   : > { %s6138_s25 = sld [smem:[#allocation11_spill]] }
 0x475   : > { %s6139_s21 = sld [smem:[#allocation13_spill]] }
 0x479   : > { %p4462_p8 = scmp.ge.s32.totalorder %s6137_s15, 2 }
 0x47a   : > { %s3581_s30 = sand.u32 1, %s6138_s25  }
 0x47b   : > { %p6140_p7 = scmp.ne.s32.totalorder %s6139_s21, 0  ;;  %s3582_s18 = scalar_lea.sflag [#allocation4], %s3581_s30 }
 0x47d   : > { %p4456_p9 = pnand %p4462_p8, %p6140_p7 }
 0x47f   : > { %p4457_p10 = pneg %p4456_p9 }
 0x481   : > { %4967 = dma.done.wait (%p4457_p10), %s3582_s18, 384  }
 0x482   : > { %4969 = vsyncadd (%p4457_p10), %s3582_s18, 4294966912  ;;  %s21_s25 = sadd.s32 1, %s6137_s15   ;;  %s6141_s5 = sld [smem:[#allocation14_spill]] }
 0x483   : > { %p18_p12 = scmp.ge.s32.totalorder %s21_s25, 6   ;;  %s6142_s7 = sld [smem:[#allocation15_spill]] }
 0x484   : > { %s6143_s15 = smov %s4976_s16  ;;  %s6144_s16 = smov %s4980_s17 }
 0x485   : > { %s6145_s17 = smov %s5173_s14  ;;  %s6146_s18 = smov %s4988_s19 }
 0x486   : > { %s6147_s19 = smov %s4992_s20  ;;  %s6148_s20 = smov %s5164_s10 }
 0x487   : > { %s6149_s21 = smov %s5004_s23  ;;  %s6150_s22 = smov %s5008_s24 }
 0x488   : > { %s6151_s23 = smov %s6141_s5  ;;  %20 = sbr.rel (!%p18_p12) target bundleno = 12 (0xc), region = 104 }
 0x489   : > { %s6152_s24 = smov %s6142_s7 }
 0x48d   :  { %3587 = vsyncpa [#allocation3], 1 }
 0x48e   :  { %3589 = vsyncpa [#allocation3 + $0x1], 1 }
 0x48f   :  { %3590 = vsyncpa [#allocation6], 1 }
 0x490   :  { %3591 = vsyncpa [#allocation4], 1 }
 0x491   :  { %3593 = vsyncpa [#allocation4 + $0x1], 1 }

</bundles_post_ra>
